<compile_context>
chip_gen: v5e
topology: v5e:2x2
jax: 0.10.0
libtpu: 0.0.40
codegen_flags: <defaults>
</compile_context>

<pallas_src>
import functools

import jax
import jax.numpy as jnp
from jax.experimental import pallas as pl
from jax.experimental.pallas import tpu as pltpu

VMEM = functools.partial(pl.BlockSpec, memory_space=pltpu.MemorySpace.VMEM)
SMEM = functools.partial(pl.BlockSpec, memory_space=pltpu.MemorySpace.SMEM)


# ----------------------------- Pallas kernels -----------------------------

def _t1_kernel(x_ref, w_ref, b_ref, xclean_ref, hpre_ref, hrelu_ref):
    # NaN imputation + t1 linear + ReLU, fused. Emits:
    #   xclean (=raw0), h_pre (middle representation #1), relu(h_pre) (=raw1).
    x = x_ref[...]
    xc = jnp.where(jnp.isnan(x), jnp.zeros_like(x), x)
    xclean_ref[...] = xc
    hp = jnp.dot(xc, w_ref[...], preferred_element_type=jnp.float32) + b_ref[...]
    hpre_ref[...] = hp
    hrelu_ref[...] = jnp.maximum(hp, 0.0)


def t1_forward(x, w, b):
    n, nhid = x.shape[0], w.shape[1]
    return pl.pallas_call(
        _t1_kernel,
        out_shape=(
            jax.ShapeDtypeStruct(x.shape, jnp.float32),      # raw0 (imputed x)
            jax.ShapeDtypeStruct((n, nhid), jnp.float32),    # h_pre
            jax.ShapeDtypeStruct((n, nhid), jnp.float32),    # relu(h_pre)
        ),
        in_specs=[VMEM(), VMEM(), VMEM()],
        out_specs=(VMEM(), VMEM(), VMEM()),
    )(x, w, b)


def _block_kernel(eps_ref, gb_ref, h_ref, adj_ref, d_ref, wg_ref, hw_ref,
                  out_ref, *, nhid):
    # One fused block: for the 3 graphs, gated aggregation + residual + hw
    # projection + ReLU, written into a single packed [N, 3*nhid] output.
    # h_ref:   [N, D]      (D = nhid for block 1, 3*nhid for block 2; raw == h)
    # adj_ref: [3, N, N]   d_ref: [3, N, 1]
    # wg_ref:  [3, D, 2]   (col 0 = dst gate weights, col 1 = src gate weights)
    # hw_ref:  [3, D, nhid]
    # eps/gb in SMEM.
    h = h_ref[...]
    eps = eps_ref[0]
    for k in range(3):                      # unrolled; all operands already in VMEM
        d = d_ref[k]                        # [N, 1]
        s = jnp.dot(h, wg_ref[k], preferred_element_type=jnp.float32)   # [N, 2]
        a = jnp.tanh(s[:, 0:1] + jnp.transpose(s[:, 1:2]) + gb_ref[k])  # [N, N]
        # z = d * ((adj ⊙ a) @ (d * h))  — no d*d^T outer product.
        g = (adj_ref[k] * a).astype(jnp.bfloat16)
        hd = (d * h).astype(jnp.bfloat16)
        z = d * jnp.dot(g, hd, preferred_element_type=jnp.float32)      # [N, D]
        t = eps * h + z
        # TODO(synk): edge/feature dropout is identity in eval mode.
        out_ref[:, k * nhid:(k + 1) * nhid] = jnp.maximum(
            jnp.dot(t, hw_ref[k], preferred_element_type=jnp.float32), 0.0)


def gated_block(h, adj, d, wg, gb, hw, eps):
    n = h.shape[0]
    nhid = hw.shape[2]
    return pl.pallas_call(
        functools.partial(_block_kernel, nhid=nhid),
        out_shape=jax.ShapeDtypeStruct((n, 3 * nhid), jnp.float32),
        in_specs=[SMEM(), SMEM(), VMEM(), VMEM(), VMEM(), VMEM(), VMEM()],
        out_specs=VMEM(),
    )(eps, gb, h, adj, d, wg, hw)


def _head_kernel(h2_ref, r1_ref, r2_ref, r0_ref, wa_ref, wb_ref, wc_ref, wd_ref,
                 b2_ref, w3_ref, b3_ref, pre_ref, out_ref):
    # Final concat([h2, raw1, raw2, raw0]) @ t2 + b2 done as a sum of partial
    # matmuls against the pre-split t2 weight (no concat materialized), then
    # ReLU + t3, all fused.
    s = (jnp.dot(h2_ref[...], wa_ref[...], preferred_element_type=jnp.float32)
         + jnp.dot(r1_ref[...], wb_ref[...], preferred_element_type=jnp.float32)
         + jnp.dot(r2_ref[...], wc_ref[...], preferred_element_type=jnp.float32)
         + jnp.dot(r0_ref[...], wd_ref[...], preferred_element_type=jnp.float32)
         + b2_ref[...])
    pre_ref[...] = s                         # middle representation #2 (pre-ReLU)
    out_ref[...] = (
        jnp.dot(jnp.maximum(s, 0.0), w3_ref[...],
                preferred_element_type=jnp.float32)
        + b3_ref[...])


def head_forward(h2, r1, r2, r0, wa, wb, wc, wd, b2, w3, b3):
    n = h2.shape[0]
    nhid = wa.shape[1]
    nclass = w3.shape[1]
    return pl.pallas_call(
        _head_kernel,
        out_shape=(jax.ShapeDtypeStruct((n, nhid), jnp.float32),
                   jax.ShapeDtypeStruct((n, nclass), jnp.float32)),
        in_specs=[VMEM()] * 11,
        out_specs=(VMEM(), VMEM()),
    )(h2, r1, r2, r0, wa, wb, wc, wd, b2, w3, b3)


# ------------------------------- GCN forward -------------------------------

def gcn_forward(x, params, adj, d, eps):
    """Reproduces GCN.forward(x) -> (scores_model, middle_representations)."""
    eps_arr = jnp.asarray(eps, dtype=jnp.float32).reshape(1)

    # NaN imputation + t1 + ReLU fused; raw0 = imputed x, raw1 = relu(t1(x)).
    raw0, h_pre, raw1 = t1_forward(x, params["t1_w"], params["t1_b"])
    middle = [h_pre]

    # Block 1 (input h == raw1), packed output [N, 3*nhid] == cat(h1_1,h1_2,h1_3).
    raw2 = gated_block(raw1, adj, d, params["wg1"], params["gb1"],
                       params["hw1"], eps_arr)
    # Block 2 (input h == raw2), packed output [N, 3*nhid] == cat(h2_1,h2_2,h2_3).
    h2 = gated_block(raw2, adj, d, params["wg2"], params["gb2"],
                     params["hw2"], eps_arr)

    # Final head: cat(h2, raw1, raw2, raw0) -> t2 -> ReLU -> t3 (concat folded
    # into pre-split t2 weights).
    scores_pre, scores = head_forward(
        h2, raw1, raw2, raw0,
        params["t2_w_h2"], params["t2_w_r1"], params["t2_w_r2"],
        params["t2_w_r0"], params["t2_b"], params["t3_w"], params["t3_b"])
    middle.append(scores_pre)
    return scores, middle


# --------------------------- deterministic setup ---------------------------

def xavier_normal(key, shape, gain):
    fan_out, fan_in = shape
    std = gain * jnp.sqrt(2.0 / (fan_in + fan_out))
    return std * jax.random.normal(key, shape, dtype=jnp.float32)


def make_params(key, nfeat, nhid, nclass):
    # All transposes / packing / weight splits are hoisted here (done once).
    gain = 1.414
    keys = iter(jax.random.split(key, 32))
    p = {}
    # t1
    w = xavier_normal(next(keys), (nhid, nfeat), gain)
    p["t1_w"] = w.T                                                   # [nfeat, nhid]
    p["t1_b"] = (0.01 * jax.random.normal(next(keys), (nhid,))).reshape(1, nhid)
    # t2: transposed [7*nhid+nfeat, nhid], pre-split by concat segments.
    w = xavier_normal(next(keys), (nhid, 7 * nhid + nfeat), gain).T
    p["t2_w_h2"] = w[:3 * nhid]
    p["t2_w_r1"] = w[3 * nhid:4 * nhid]
    p["t2_w_r2"] = w[4 * nhid:7 * nhid]
    p["t2_w_r0"] = w[7 * nhid:]
    p["t2_b"] = (0.01 * jax.random.normal(next(keys), (nhid,))).reshape(1, nhid)
    # t3
    w = xavier_normal(next(keys), (nclass, nhid), gain)
    p["t3_w"] = w.T                                                   # [nhid, nclass]
    p["t3_b"] = (0.01 * jax.random.normal(next(keys), (nclass,))).reshape(1, nclass)
    # Gated-layer gates packed [3, D, 2] (col0 = dst half, col1 = src half of the
    # torch [1, 2D] gate weight), scalar biases [3], hw projections [3, D, nhid].
    wg1, gb1, hw1, wg2, gb2, hw2 = [], [], [], [], [], []
    for _ in range(3):
        gw = xavier_normal(next(keys), (1, 2 * nhid), gain)
        wg1.append(gw.reshape(2, nhid).T)                             # [nhid, 2]
        gb1.append(0.01 * jax.random.normal(next(keys), (), dtype=jnp.float32))
        hw1.append(xavier_normal(next(keys), (nhid, nhid), gain))
        gw = xavier_normal(next(keys), (1, 2 * 3 * nhid), gain)
        wg2.append(gw.reshape(2, 3 * nhid).T)                         # [3*nhid, 2]
        gb2.append(0.01 * jax.random.normal(next(keys), (), dtype=jnp.float32))
        hw2.append(xavier_normal(next(keys), (3 * nhid, nhid), gain))
    p["wg1"] = jnp.stack(wg1)       # [3, nhid, 2]
    p["gb1"] = jnp.stack(gb1)       # [3]
    p["hw1"] = jnp.stack(hw1)       # [3, nhid, nhid]
    p["wg2"] = jnp.stack(wg2)       # [3, 3*nhid, 2]
    p["gb2"] = jnp.stack(gb2)       # [3]
    p["hw2"] = jnp.stack(hw2)       # [3, 3*nhid, nhid]
    return p


def make_graphs(keys, n):
    # Dense random symmetric adjacencies (self-loops removed) + d = deg^-1/2,
    # stacked over the 3 graphs.
    adjs, ds = [], []
    for k in keys:
        a = jax.random.bernoulli(k, 0.3, (n, n)).astype(jnp.float32)
        adj = jnp.clip(a + a.T, 0.0, 1.0) * (1.0 - jnp.eye(n, dtype=jnp.float32))
        deg = jnp.sum(adj, axis=1, keepdims=True)
        d = 1.0 / jnp.sqrt(deg + 1.0)               # [N, 1], kept f32
        adjs.append(adj)
        ds.append(d)
    return jnp.stack(adjs), jnp.stack(ds)           # [3, N, N], [3, N, 1]


if __name__ == "__main__":
    N, NFEAT, NHID, NCLASS = 16, 16, 32, 4
    EPS = 0.3

    root = jax.random.PRNGKey(0)
    k_x, k_p, k_g1, k_g2, k_g3 = jax.random.split(root, 5)

    x = jax.random.normal(k_x, (N, NFEAT), dtype=jnp.float32)
    x = x.at[0, 0].set(jnp.nan)                     # exercise the NaN-imputation path

    params = make_params(k_p, NFEAT, NHID, NCLASS)
    adj, d = make_graphs([k_g1, k_g2, k_g3], N)

    fwd = jax.jit(lambda xx, e: gcn_forward(xx, params, adj, d, e))
    scores, middle = fwd(x, jnp.float32(EPS))
    jax.block_until_ready(scores)
    jax.block_until_ready(middle)

    assert scores.shape == (N, NCLASS)
    assert middle[0].shape == (N, NHID) and middle[1].shape == (N, NHID)
    assert not bool(jnp.any(jnp.isnan(scores)))
    print("KERNEL_OK")
</pallas_src>

<mosaic_0001>
module attributes {stable_mosaic.version = 11 : i64} {
  func.func @_block_kernel(%arg0: memref<1xf32, #tpu.memory_space<smem>>, %arg1: memref<3xf32, #tpu.memory_space<smem>>, %arg2: memref<16x32xf32, #tpu.memory_space<vmem>>, %arg3: memref<3x16x16xf32, #tpu.memory_space<vmem>>, %arg4: memref<3x16x1xf32, #tpu.memory_space<vmem>>, %arg5: memref<3x32x2xf32, #tpu.memory_space<vmem>>, %arg6: memref<3x32x32xf32, #tpu.memory_space<vmem>>, %arg7: memref<16x96xf32, #tpu.memory_space<vmem>>) attributes {dimension_semantics = [], scalar_prefetch = 0 : i64, scratch_operands = 0 : i64, tpu.core_type = #tpu.core_type<tc>} {
    %c0 = arith.constant 0 : index
    %c0_0 = arith.constant 0 : index
    %0 = vector.load %arg2[%c0, %c0_0] : memref<16x32xf32, #tpu.memory_space<vmem>>, vector<16x32xf32>
    %c0_1 = arith.constant 0 : index
    %1 = memref.load %arg0[%c0_1] : memref<1xf32, #tpu.memory_space<smem>>
    %c0_2 = arith.constant 0 : index
    %c0_3 = arith.constant 0 : index
    %c0_4 = arith.constant 0 : index
    %2 = vector.load %arg4[%c0_2, %c0_3, %c0_4] : memref<3x16x1xf32, #tpu.memory_space<vmem>>, vector<1x16x1xf32>
    %3 = vector.shape_cast %2 : vector<1x16x1xf32> to vector<16x1xf32>
    %c0_5 = arith.constant 0 : index
    %c0_6 = arith.constant 0 : index
    %c0_7 = arith.constant 0 : index
    %4 = vector.load %arg5[%c0_5, %c0_6, %c0_7] : memref<3x32x2xf32, #tpu.memory_space<vmem>>, vector<1x32x2xf32>
    %5 = vector.shape_cast %4 : vector<1x32x2xf32> to vector<32x2xf32>
    %cst = arith.constant dense<0.000000e+00> : vector<16x2xf32>
    %6 = tpu.matmul %0, %5, %cst {dimension_numbers = #tpu.dot_dimension_numbers<[1], [0], [0], [1], [0, 0, 1, 1], [], []>} : vector<16x32xf32>, vector<32x2xf32>, vector<16x2xf32> -> vector<16x2xf32>
    %7 = vector.extract_strided_slice %6 {offsets = [0, 0], sizes = [16, 1], strides = [1, 1]} : vector<16x2xf32> to vector<16x1xf32>
    %8 = vector.extract_strided_slice %6 {offsets = [0, 1], sizes = [16, 1], strides = [1, 1]} : vector<16x2xf32> to vector<16x1xf32>
    %9 = tpu.transpose %8, [1, 0] : vector<16x1xf32> -> vector<1x16xf32>
    %10 = vector.broadcast %7 : vector<16x1xf32> to vector<16x16xf32>
    %11 = vector.broadcast %9 : vector<1x16xf32> to vector<16x16xf32>
    %12 = arith.addf %10, %11 : vector<16x16xf32>
    %c0_8 = arith.constant 0 : index
    %13 = memref.load %arg1[%c0_8] : memref<3xf32, #tpu.memory_space<smem>>
    %14 = vector.broadcast %13 : f32 to vector<16x16xf32>
    %15 = arith.addf %12, %14 : vector<16x16xf32>
    %16 = math.tanh %15 : vector<16x16xf32>
    %c0_9 = arith.constant 0 : index
    %c0_10 = arith.constant 0 : index
    %c0_11 = arith.constant 0 : index
    %17 = vector.load %arg3[%c0_9, %c0_10, %c0_11] : memref<3x16x16xf32, #tpu.memory_space<vmem>>, vector<1x16x16xf32>
    %18 = vector.shape_cast %17 : vector<1x16x16xf32> to vector<16x16xf32>
    %19 = arith.mulf %18, %16 : vector<16x16xf32>
    %20 = arith.truncf %19 : vector<16x16xf32> to vector<16x16xbf16>
    %21 = vector.broadcast %3 : vector<16x1xf32> to vector<16x32xf32>
    %22 = arith.mulf %21, %0 : vector<16x32xf32>
    %23 = arith.truncf %22 : vector<16x32xf32> to vector<16x32xbf16>
    %cst_12 = arith.constant dense<0.000000e+00> : vector<16x32xf32>
    %24 = tpu.matmul %20, %23, %cst_12 {dimension_numbers = #tpu.dot_dimension_numbers<[1], [0], [0], [1], [0, 0, 1, 1], [], []>} : vector<16x16xbf16>, vector<16x32xbf16>, vector<16x32xf32> -> vector<16x32xf32>
    %25 = vector.broadcast %3 : vector<16x1xf32> to vector<16x32xf32>
    %26 = arith.mulf %25, %24 : vector<16x32xf32>
    %27 = vector.broadcast %1 : f32 to vector<16x32xf32>
    %28 = arith.mulf %27, %0 : vector<16x32xf32>
    %29 = arith.addf %28, %26 : vector<16x32xf32>
    %c0_13 = arith.constant 0 : index
    %c0_14 = arith.constant 0 : index
    %c0_15 = arith.constant 0 : index
    %30 = vector.load %arg6[%c0_13, %c0_14, %c0_15] : memref<3x32x32xf32, #tpu.memory_space<vmem>>, vector<1x32x32xf32>
    %31 = vector.shape_cast %30 : vector<1x32x32xf32> to vector<32x32xf32>
    %cst_16 = arith.constant dense<0.000000e+00> : vector<16x32xf32>
    %32 = tpu.matmul %29, %31, %cst_16 {dimension_numbers = #tpu.dot_dimension_numbers<[1], [0], [0], [1], [0, 0, 1, 1], [], []>} : vector<16x32xf32>, vector<32x32xf32>, vector<16x32xf32> -> vector<16x32xf32>
    %cst_17 = arith.constant 0.000000e+00 : f32
    %33 = vector.broadcast %cst_17 : f32 to vector<16x32xf32>
    %34 = arith.maximumf %32, %33 : vector<16x32xf32>
    %c0_18 = arith.constant 0 : index
    %c0_19 = arith.constant 0 : index
    %35 = vector.load %arg7[%c0_18, %c0_19] : memref<16x96xf32, #tpu.memory_space<vmem>>, vector<16x32xf32>
    tpu.vector_store %arg7[%c0_18, %c0_19], %34 {strides = array<i32>} : memref<16x96xf32, #tpu.memory_space<vmem>>, vector<16x32xf32>,
    %c1 = arith.constant 1 : index
    %c0_20 = arith.constant 0 : index
    %c0_21 = arith.constant 0 : index
    %36 = vector.load %arg4[%c1, %c0_20, %c0_21] : memref<3x16x1xf32, #tpu.memory_space<vmem>>, vector<1x16x1xf32>
    %37 = vector.shape_cast %36 : vector<1x16x1xf32> to vector<16x1xf32>
    %c1_22 = arith.constant 1 : index
    %c0_23 = arith.constant 0 : index
    %c0_24 = arith.constant 0 : index
    %38 = vector.load %arg5[%c1_22, %c0_23, %c0_24] : memref<3x32x2xf32, #tpu.memory_space<vmem>>, vector<1x32x2xf32>
    %39 = vector.shape_cast %38 : vector<1x32x2xf32> to vector<32x2xf32>
    %cst_25 = arith.constant dense<0.000000e+00> : vector<16x2xf32>
    %40 = tpu.matmul %0, %39, %cst_25 {dimension_numbers = #tpu.dot_dimension_numbers<[1], [0], [0], [1], [0, 0, 1, 1], [], []>} : vector<16x32xf32>, vector<32x2xf32>, vector<16x2xf32> -> vector<16x2xf32>
    %41 = vector.extract_strided_slice %40 {offsets = [0, 0], sizes = [16, 1], strides = [1, 1]} : vector<16x2xf32> to vector<16x1xf32>
    %42 = vector.extract_strided_slice %40 {offsets = [0, 1], sizes = [16, 1], strides = [1, 1]} : vector<16x2xf32> to vector<16x1xf32>
    %43 = tpu.transpose %42, [1, 0] : vector<16x1xf32> -> vector<1x16xf32>
    %44 = vector.broadcast %41 : vector<16x1xf32> to vector<16x16xf32>
    %45 = vector.broadcast %43 : vector<1x16xf32> to vector<16x16xf32>
    %46 = arith.addf %44, %45 : vector<16x16xf32>
    %c1_26 = arith.constant 1 : index
    %47 = memref.load %arg1[%c1_26] : memref<3xf32, #tpu.memory_space<smem>>
    %48 = vector.broadcast %47 : f32 to vector<16x16xf32>
    %49 = arith.addf %46, %48 : vector<16x16xf32>
    %50 = math.tanh %49 : vector<16x16xf32>
    %c1_27 = arith.constant 1 : index
    %c0_28 = arith.constant 0 : index
    %c0_29 = arith.constant 0 : index
    %51 = vector.load %arg3[%c1_27, %c0_28, %c0_29] : memref<3x16x16xf32, #tpu.memory_space<vmem>>, vector<1x16x16xf32>
    %52 = vector.shape_cast %51 : vector<1x16x16xf32> to vector<16x16xf32>
    %53 = arith.mulf %52, %50 : vector<16x16xf32>
    %54 = arith.truncf %53 : vector<16x16xf32> to vector<16x16xbf16>
    %55 = vector.broadcast %37 : vector<16x1xf32> to vector<16x32xf32>
    %56 = arith.mulf %55, %0 : vector<16x32xf32>
    %57 = arith.truncf %56 : vector<16x32xf32> to vector<16x32xbf16>
    %cst_30 = arith.constant dense<0.000000e+00> : vector<16x32xf32>
    %58 = tpu.matmul %54, %57, %cst_30 {dimension_numbers = #tpu.dot_dimension_numbers<[1], [0], [0], [1], [0, 0, 1, 1], [], []>} : vector<16x16xbf16>, vector<16x32xbf16>, vector<16x32xf32> -> vector<16x32xf32>
    %59 = vector.broadcast %37 : vector<16x1xf32> to vector<16x32xf32>
    %60 = arith.mulf %59, %58 : vector<16x32xf32>
    %61 = vector.broadcast %1 : f32 to vector<16x32xf32>
    %62 = arith.mulf %61, %0 : vector<16x32xf32>
    %63 = arith.addf %62, %60 : vector<16x32xf32>
    %c1_31 = arith.constant 1 : index
    %c0_32 = arith.constant 0 : index
    %c0_33 = arith.constant 0 : index
    %64 = vector.load %arg6[%c1_31, %c0_32, %c0_33] : memref<3x32x32xf32, #tpu.memory_space<vmem>>, vector<1x32x32xf32>
    %65 = vector.shape_cast %64 : vector<1x32x32xf32> to vector<32x32xf32>
    %cst_34 = arith.constant dense<0.000000e+00> : vector<16x32xf32>
    %66 = tpu.matmul %63, %65, %cst_34 {dimension_numbers = #tpu.dot_dimension_numbers<[1], [0], [0], [1], [0, 0, 1, 1], [], []>} : vector<16x32xf32>, vector<32x32xf32>, vector<16x32xf32> -> vector<16x32xf32>
    %cst_35 = arith.constant 0.000000e+00 : f32
    %67 = vector.broadcast %cst_35 : f32 to vector<16x32xf32>
    %68 = arith.maximumf %66, %67 : vector<16x32xf32>
    %c0_36 = arith.constant 0 : index
    %c32 = arith.constant 32 : index
    %69 = vector.load %arg7[%c0_36, %c32] : memref<16x96xf32, #tpu.memory_space<vmem>>, vector<16x32xf32>
    tpu.vector_store %arg7[%c0_36, %c32], %68 {strides = array<i32>} : memref<16x96xf32, #tpu.memory_space<vmem>>, vector<16x32xf32>,
    %c2 = arith.constant 2 : index
    %c0_37 = arith.constant 0 : index
    %c0_38 = arith.constant 0 : index
    %70 = vector.load %arg4[%c2, %c0_37, %c0_38] : memref<3x16x1xf32, #tpu.memory_space<vmem>>, vector<1x16x1xf32>
    %71 = vector.shape_cast %70 : vector<1x16x1xf32> to vector<16x1xf32>
    %c2_39 = arith.constant 2 : index
    %c0_40 = arith.constant 0 : index
    %c0_41 = arith.constant 0 : index
    %72 = vector.load %arg5[%c2_39, %c0_40, %c0_41] : memref<3x32x2xf32, #tpu.memory_space<vmem>>, vector<1x32x2xf32>
    %73 = vector.shape_cast %72 : vector<1x32x2xf32> to vector<32x2xf32>
    %cst_42 = arith.constant dense<0.000000e+00> : vector<16x2xf32>
    %74 = tpu.matmul %0, %73, %cst_42 {dimension_numbers = #tpu.dot_dimension_numbers<[1], [0], [0], [1], [0, 0, 1, 1], [], []>} : vector<16x32xf32>, vector<32x2xf32>, vector<16x2xf32> -> vector<16x2xf32>
    %75 = vector.extract_strided_slice %74 {offsets = [0, 0], sizes = [16, 1], strides = [1, 1]} : vector<16x2xf32> to vector<16x1xf32>
    %76 = vector.extract_strided_slice %74 {offsets = [0, 1], sizes = [16, 1], strides = [1, 1]} : vector<16x2xf32> to vector<16x1xf32>
    %77 = tpu.transpose %76, [1, 0] : vector<16x1xf32> -> vector<1x16xf32>
    %78 = vector.broadcast %75 : vector<16x1xf32> to vector<16x16xf32>
    %79 = vector.broadcast %77 : vector<1x16xf32> to vector<16x16xf32>
    %80 = arith.addf %78, %79 : vector<16x16xf32>
    %c2_43 = arith.constant 2 : index
    %81 = memref.load %arg1[%c2_43] : memref<3xf32, #tpu.memory_space<smem>>
    %82 = vector.broadcast %81 : f32 to vector<16x16xf32>
    %83 = arith.addf %80, %82 : vector<16x16xf32>
    %84 = math.tanh %83 : vector<16x16xf32>
    %c2_44 = arith.constant 2 : index
    %c0_45 = arith.constant 0 : index
    %c0_46 = arith.constant 0 : index
    %85 = vector.load %arg3[%c2_44, %c0_45, %c0_46] : memref<3x16x16xf32, #tpu.memory_space<vmem>>, vector<1x16x16xf32>
    %86 = vector.shape_cast %85 : vector<1x16x16xf32> to vector<16x16xf32>
    %87 = arith.mulf %86, %84 : vector<16x16xf32>
    %88 = arith.truncf %87 : vector<16x16xf32> to vector<16x16xbf16>
    %89 = vector.broadcast %71 : vector<16x1xf32> to vector<16x32xf32>
    %90 = arith.mulf %89, %0 : vector<16x32xf32>
    %91 = arith.truncf %90 : vector<16x32xf32> to vector<16x32xbf16>
    %cst_47 = arith.constant dense<0.000000e+00> : vector<16x32xf32>
    %92 = tpu.matmul %88, %91, %cst_47 {dimension_numbers = #tpu.dot_dimension_numbers<[1], [0], [0], [1], [0, 0, 1, 1], [], []>} : vector<16x16xbf16>, vector<16x32xbf16>, vector<16x32xf32> -> vector<16x32xf32>
    %93 = vector.broadcast %71 : vector<16x1xf32> to vector<16x32xf32>
    %94 = arith.mulf %93, %92 : vector<16x32xf32>
    %95 = vector.broadcast %1 : f32 to vector<16x32xf32>
    %96 = arith.mulf %95, %0 : vector<16x32xf32>
    %97 = arith.addf %96, %94 : vector<16x32xf32>
    %c2_48 = arith.constant 2 : index
    %c0_49 = arith.constant 0 : index
    %c0_50 = arith.constant 0 : index
    %98 = vector.load %arg6[%c2_48, %c0_49, %c0_50] : memref<3x32x32xf32, #tpu.memory_space<vmem>>, vector<1x32x32xf32>
    %99 = vector.shape_cast %98 : vector<1x32x32xf32> to vector<32x32xf32>
    %cst_51 = arith.constant dense<0.000000e+00> : vector<16x32xf32>
    %100 = tpu.matmul %97, %99, %cst_51 {dimension_numbers = #tpu.dot_dimension_numbers<[1], [0], [0], [1], [0, 0, 1, 1], [], []>} : vector<16x32xf32>, vector<32x32xf32>, vector<16x32xf32> -> vector<16x32xf32>
    %cst_52 = arith.constant 0.000000e+00 : f32
    %101 = vector.broadcast %cst_52 : f32 to vector<16x32xf32>
    %102 = arith.maximumf %100, %101 : vector<16x32xf32>
    %c0_53 = arith.constant 0 : index
    %c64 = arith.constant 64 : index
    %103 = vector.load %arg7[%c0_53, %c64] : memref<16x96xf32, #tpu.memory_space<vmem>>, vector<16x32xf32>
    tpu.vector_store %arg7[%c0_53, %c64], %102 {strides = array<i32>} : memref<16x96xf32, #tpu.memory_space<vmem>>, vector<16x32xf32>,
    return
  }
}

module attributes {stable_mosaic.version = 11 : i64} {
  func.func @_t1_kernel(%arg0: memref<16x16xf32, #tpu.memory_space<vmem>>, %arg1: memref<16x32xf32, #tpu.memory_space<vmem>>, %arg2: memref<1x32xf32, #tpu.memory_space<vmem>>, %arg3: memref<16x16xf32, #tpu.memory_space<vmem>>, %arg4: memref<16x32xf32, #tpu.memory_space<vmem>>, %arg5: memref<16x32xf32, #tpu.memory_space<vmem>>) attributes {dimension_semantics = [], scalar_prefetch = 0 : i64, scratch_operands = 0 : i64, tpu.core_type = #tpu.core_type<tc>} {
    %c0 = arith.constant 0 : index
    %c0_0 = arith.constant 0 : index
    %0 = vector.load %arg0[%c0, %c0_0] : memref<16x16xf32, #tpu.memory_space<vmem>>, vector<16x16xf32>
    %1 = arith.cmpf one, %0, %0 : vector<16x16xf32>
    %cst = arith.constant 0.000000e+00 : f32
    %2 = vector.broadcast %cst : f32 to vector<16x16xf32>
    %3 = arith.select %1, %2, %0 : vector<16x16xi1>, vector<16x16xf32>
    %c0_1 = arith.constant 0 : index
    %c0_2 = arith.constant 0 : index
    %4 = vector.load %arg3[%c0_1, %c0_2] : memref<16x16xf32, #tpu.memory_space<vmem>>, vector<16x16xf32>
    tpu.vector_store %arg3[%c0_1, %c0_2], %3 {strides = array<i32>} : memref<16x16xf32, #tpu.memory_space<vmem>>, vector<16x16xf32>,
    %c0_3 = arith.constant 0 : index
    %c0_4 = arith.constant 0 : index
    %5 = vector.load %arg1[%c0_3, %c0_4] : memref<16x32xf32, #tpu.memory_space<vmem>>, vector<16x32xf32>
    %cst_5 = arith.constant dense<0.000000e+00> : vector<16x32xf32>
    %6 = tpu.matmul %3, %5, %cst_5 {dimension_numbers = #tpu.dot_dimension_numbers<[1], [0], [0], [1], [0, 0, 1, 1], [], []>} : vector<16x16xf32>, vector<16x32xf32>, vector<16x32xf32> -> vector<16x32xf32>
    %c0_6 = arith.constant 0 : index
    %c0_7 = arith.constant 0 : index
    %7 = vector.load %arg2[%c0_6, %c0_7] : memref<1x32xf32, #tpu.memory_space<vmem>>, vector<1x32xf32>
    %8 = vector.broadcast %7 : vector<1x32xf32> to vector<16x32xf32>
    %9 = arith.addf %6, %8 : vector<16x32xf32>
    %c0_8 = arith.constant 0 : index
    %c0_9 = arith.constant 0 : index
    %10 = vector.load %arg4[%c0_8, %c0_9] : memref<16x32xf32, #tpu.memory_space<vmem>>, vector<16x32xf32>
    tpu.vector_store %arg4[%c0_8, %c0_9], %9 {strides = array<i32>} : memref<16x32xf32, #tpu.memory_space<vmem>>, vector<16x32xf32>,
    %cst_10 = arith.constant 0.000000e+00 : f32
    %11 = vector.broadcast %cst_10 : f32 to vector<16x32xf32>
    %12 = arith.maximumf %9, %11 : vector<16x32xf32>
    %c0_11 = arith.constant 0 : index
    %c0_12 = arith.constant 0 : index
    %13 = vector.load %arg5[%c0_11, %c0_12] : memref<16x32xf32, #tpu.memory_space<vmem>>, vector<16x32xf32>
    tpu.vector_store %arg5[%c0_11, %c0_12], %12 {strides = array<i32>} : memref<16x32xf32, #tpu.memory_space<vmem>>, vector<16x32xf32>,
    return
  }
}

module attributes {stable_mosaic.version = 11 : i64} {
  func.func @_head_kernel(%arg0: memref<16x96xf32, #tpu.memory_space<vmem>>, %arg1: memref<16x32xf32, #tpu.memory_space<vmem>>, %arg2: memref<16x96xf32, #tpu.memory_space<vmem>>, %arg3: memref<16x16xf32, #tpu.memory_space<vmem>>, %arg4: memref<96x32xf32, #tpu.memory_space<vmem>>, %arg5: memref<32x32xf32, #tpu.memory_space<vmem>>, %arg6: memref<96x32xf32, #tpu.memory_space<vmem>>, %arg7: memref<16x32xf32, #tpu.memory_space<vmem>>, %arg8: memref<1x32xf32, #tpu.memory_space<vmem>>, %arg9: memref<32x4xf32, #tpu.memory_space<vmem>>, %arg10: memref<1x4xf32, #tpu.memory_space<vmem>>, %arg11: memref<16x32xf32, #tpu.memory_space<vmem>>, %arg12: memref<16x4xf32, #tpu.memory_space<vmem>>) attributes {dimension_semantics = [], scalar_prefetch = 0 : i64, scratch_operands = 0 : i64, tpu.core_type = #tpu.core_type<tc>} {
    %c0 = arith.constant 0 : index
    %c0_0 = arith.constant 0 : index
    %0 = vector.load %arg0[%c0, %c0_0] : memref<16x96xf32, #tpu.memory_space<vmem>>, vector<16x96xf32>
    %c0_1 = arith.constant 0 : index
    %c0_2 = arith.constant 0 : index
    %1 = vector.load %arg4[%c0_1, %c0_2] : memref<96x32xf32, #tpu.memory_space<vmem>>, vector<96x32xf32>
    %cst = arith.constant dense<0.000000e+00> : vector<16x32xf32>
    %2 = tpu.matmul %0, %1, %cst {dimension_numbers = #tpu.dot_dimension_numbers<[1], [0], [0], [1], [0, 0, 1, 1], [], []>} : vector<16x96xf32>, vector<96x32xf32>, vector<16x32xf32> -> vector<16x32xf32>
    %c0_3 = arith.constant 0 : index
    %c0_4 = arith.constant 0 : index
    %3 = vector.load %arg1[%c0_3, %c0_4] : memref<16x32xf32, #tpu.memory_space<vmem>>, vector<16x32xf32>
    %c0_5 = arith.constant 0 : index
    %c0_6 = arith.constant 0 : index
    %4 = vector.load %arg5[%c0_5, %c0_6] : memref<32x32xf32, #tpu.memory_space<vmem>>, vector<32x32xf32>
    %cst_7 = arith.constant dense<0.000000e+00> : vector<16x32xf32>
    %5 = tpu.matmul %3, %4, %cst_7 {dimension_numbers = #tpu.dot_dimension_numbers<[1], [0], [0], [1], [0, 0, 1, 1], [], []>} : vector<16x32xf32>, vector<32x32xf32>, vector<16x32xf32> -> vector<16x32xf32>
    %6 = arith.addf %2, %5 : vector<16x32xf32>
    %c0_8 = arith.constant 0 : index
    %c0_9 = arith.constant 0 : index
    %7 = vector.load %arg2[%c0_8, %c0_9] : memref<16x96xf32, #tpu.memory_space<vmem>>, vector<16x96xf32>
    %c0_10 = arith.constant 0 : index
    %c0_11 = arith.constant 0 : index
    %8 = vector.load %arg6[%c0_10, %c0_11] : memref<96x32xf32, #tpu.memory_space<vmem>>, vector<96x32xf32>
    %cst_12 = arith.constant dense<0.000000e+00> : vector<16x32xf32>
    %9 = tpu.matmul %7, %8, %cst_12 {dimension_numbers = #tpu.dot_dimension_numbers<[1], [0], [0], [1], [0, 0, 1, 1], [], []>} : vector<16x96xf32>, vector<96x32xf32>, vector<16x32xf32> -> vector<16x32xf32>
    %10 = arith.addf %6, %9 : vector<16x32xf32>
    %c0_13 = arith.constant 0 : index
    %c0_14 = arith.constant 0 : index
    %11 = vector.load %arg3[%c0_13, %c0_14] : memref<16x16xf32, #tpu.memory_space<vmem>>, vector<16x16xf32>
    %c0_15 = arith.constant 0 : index
    %c0_16 = arith.constant 0 : index
    %12 = vector.load %arg7[%c0_15, %c0_16] : memref<16x32xf32, #tpu.memory_space<vmem>>, vector<16x32xf32>
    %cst_17 = arith.constant dense<0.000000e+00> : vector<16x32xf32>
    %13 = tpu.matmul %11, %12, %cst_17 {dimension_numbers = #tpu.dot_dimension_numbers<[1], [0], [0], [1], [0, 0, 1, 1], [], []>} : vector<16x16xf32>, vector<16x32xf32>, vector<16x32xf32> -> vector<16x32xf32>
    %14 = arith.addf %10, %13 : vector<16x32xf32>
    %c0_18 = arith.constant 0 : index
    %c0_19 = arith.constant 0 : index
    %15 = vector.load %arg8[%c0_18, %c0_19] : memref<1x32xf32, #tpu.memory_space<vmem>>, vector<1x32xf32>
    %16 = vector.broadcast %15 : vector<1x32xf32> to vector<16x32xf32>
    %17 = arith.addf %14, %16 : vector<16x32xf32>
    %c0_20 = arith.constant 0 : index
    %c0_21 = arith.constant 0 : index
    %18 = vector.load %arg11[%c0_20, %c0_21] : memref<16x32xf32, #tpu.memory_space<vmem>>, vector<16x32xf32>
    tpu.vector_store %arg11[%c0_20, %c0_21], %17 {strides = array<i32>} : memref<16x32xf32, #tpu.memory_space<vmem>>, vector<16x32xf32>,
    %cst_22 = arith.constant 0.000000e+00 : f32
    %19 = vector.broadcast %cst_22 : f32 to vector<16x32xf32>
    %20 = arith.maximumf %17, %19 : vector<16x32xf32>
    %c0_23 = arith.constant 0 : index
    %c0_24 = arith.constant 0 : index
    %21 = vector.load %arg9[%c0_23, %c0_24] : memref<32x4xf32, #tpu.memory_space<vmem>>, vector<32x4xf32>
    %cst_25 = arith.constant dense<0.000000e+00> : vector<16x4xf32>
    %22 = tpu.matmul %20, %21, %cst_25 {dimension_numbers = #tpu.dot_dimension_numbers<[1], [0], [0], [1], [0, 0, 1, 1], [], []>} : vector<16x32xf32>, vector<32x4xf32>, vector<16x4xf32> -> vector<16x4xf32>
    %c0_26 = arith.constant 0 : index
    %c0_27 = arith.constant 0 : index
    %23 = vector.load %arg10[%c0_26, %c0_27] : memref<1x4xf32, #tpu.memory_space<vmem>>, vector<1x4xf32>
    %24 = vector.broadcast %23 : vector<1x4xf32> to vector<16x4xf32>
    %25 = arith.addf %22, %24 : vector<16x4xf32>
    %c0_28 = arith.constant 0 : index
    %c0_29 = arith.constant 0 : index
    %26 = vector.load %arg12[%c0_28, %c0_29] : memref<16x4xf32, #tpu.memory_space<vmem>>, vector<16x4xf32>
    tpu.vector_store %arg12[%c0_28, %c0_29], %25 {strides = array<i32>} : memref<16x4xf32, #tpu.memory_space<vmem>>, vector<16x4xf32>,
    return
  }
}

module attributes {stable_mosaic.version = 11 : i64} {
  func.func @_block_kernel(%arg0: memref<1xf32, #tpu.memory_space<smem>>, %arg1: memref<3xf32, #tpu.memory_space<smem>>, %arg2: memref<16x96xf32, #tpu.memory_space<vmem>>, %arg3: memref<3x16x16xf32, #tpu.memory_space<vmem>>, %arg4: memref<3x16x1xf32, #tpu.memory_space<vmem>>, %arg5: memref<3x96x2xf32, #tpu.memory_space<vmem>>, %arg6: memref<3x96x32xf32, #tpu.memory_space<vmem>>, %arg7: memref<16x96xf32, #tpu.memory_space<vmem>>) attributes {dimension_semantics = [], scalar_prefetch = 0 : i64, scratch_operands = 0 : i64, tpu.core_type = #tpu.core_type<tc>} {
    %c0 = arith.constant 0 : index
    %c0_0 = arith.constant 0 : index
    %0 = vector.load %arg2[%c0, %c0_0] : memref<16x96xf32, #tpu.memory_space<vmem>>, vector<16x96xf32>
    %c0_1 = arith.constant 0 : index
    %1 = memref.load %arg0[%c0_1] : memref<1xf32, #tpu.memory_space<smem>>
    %c0_2 = arith.constant 0 : index
    %c0_3 = arith.constant 0 : index
    %c0_4 = arith.constant 0 : index
    %2 = vector.load %arg4[%c0_2, %c0_3, %c0_4] : memref<3x16x1xf32, #tpu.memory_space<vmem>>, vector<1x16x1xf32>
    %3 = vector.shape_cast %2 : vector<1x16x1xf32> to vector<16x1xf32>
    %c0_5 = arith.constant 0 : index
    %c0_6 = arith.constant 0 : index
    %c0_7 = arith.constant 0 : index
    %4 = vector.load %arg5[%c0_5, %c0_6, %c0_7] : memref<3x96x2xf32, #tpu.memory_space<vmem>>, vector<1x96x2xf32>
    %5 = vector.shape_cast %4 : vector<1x96x2xf32> to vector<96x2xf32>
    %cst = arith.constant dense<0.000000e+00> : vector<16x2xf32>
    %6 = tpu.matmul %0, %5, %cst {dimension_numbers = #tpu.dot_dimension_numbers<[1], [0], [0], [1], [0, 0, 1, 1], [], []>} : vector<16x96xf32>, vector<96x2xf32>, vector<16x2xf32> -> vector<16x2xf32>
    %7 = vector.extract_strided_slice %6 {offsets = [0, 0], sizes = [16, 1], strides = [1, 1]} : vector<16x2xf32> to vector<16x1xf32>
    %8 = vector.extract_strided_slice %6 {offsets = [0, 1], sizes = [16, 1], strides = [1, 1]} : vector<16x2xf32> to vector<16x1xf32>
    %9 = tpu.transpose %8, [1, 0] : vector<16x1xf32> -> vector<1x16xf32>
    %10 = vector.broadcast %7 : vector<16x1xf32> to vector<16x16xf32>
    %11 = vector.broadcast %9 : vector<1x16xf32> to vector<16x16xf32>
    %12 = arith.addf %10, %11 : vector<16x16xf32>
    %c0_8 = arith.constant 0 : index
    %13 = memref.load %arg1[%c0_8] : memref<3xf32, #tpu.memory_space<smem>>
    %14 = vector.broadcast %13 : f32 to vector<16x16xf32>
    %15 = arith.addf %12, %14 : vector<16x16xf32>
    %16 = math.tanh %15 : vector<16x16xf32>
    %c0_9 = arith.constant 0 : index
    %c0_10 = arith.constant 0 : index
    %c0_11 = arith.constant 0 : index
    %17 = vector.load %arg3[%c0_9, %c0_10, %c0_11] : memref<3x16x16xf32, #tpu.memory_space<vmem>>, vector<1x16x16xf32>
    %18 = vector.shape_cast %17 : vector<1x16x16xf32> to vector<16x16xf32>
    %19 = arith.mulf %18, %16 : vector<16x16xf32>
    %20 = arith.truncf %19 : vector<16x16xf32> to vector<16x16xbf16>
    %21 = vector.broadcast %3 : vector<16x1xf32> to vector<16x96xf32>
    %22 = arith.mulf %21, %0 : vector<16x96xf32>
    %23 = arith.truncf %22 : vector<16x96xf32> to vector<16x96xbf16>
    %cst_12 = arith.constant dense<0.000000e+00> : vector<16x96xf32>
    %24 = tpu.matmul %20, %23, %cst_12 {dimension_numbers = #tpu.dot_dimension_numbers<[1], [0], [0], [1], [0, 0, 1, 1], [], []>} : vector<16x16xbf16>, vector<16x96xbf16>, vector<16x96xf32> -> vector<16x96xf32>
    %25 = vector.broadcast %3 : vector<16x1xf32> to vector<16x96xf32>
    %26 = arith.mulf %25, %24 : vector<16x96xf32>
    %27 = vector.broadcast %1 : f32 to vector<16x96xf32>
    %28 = arith.mulf %27, %0 : vector<16x96xf32>
    %29 = arith.addf %28, %26 : vector<16x96xf32>
    %c0_13 = arith.constant 0 : index
    %c0_14 = arith.constant 0 : index
    %c0_15 = arith.constant 0 : index
    %30 = vector.load %arg6[%c0_13, %c0_14, %c0_15] : memref<3x96x32xf32, #tpu.memory_space<vmem>>, vector<1x96x32xf32>
    %31 = vector.shape_cast %30 : vector<1x96x32xf32> to vector<96x32xf32>
    %cst_16 = arith.constant dense<0.000000e+00> : vector<16x32xf32>
    %32 = tpu.matmul %29, %31, %cst_16 {dimension_numbers = #tpu.dot_dimension_numbers<[1], [0], [0], [1], [0, 0, 1, 1], [], []>} : vector<16x96xf32>, vector<96x32xf32>, vector<16x32xf32> -> vector<16x32xf32>
    %cst_17 = arith.constant 0.000000e+00 : f32
    %33 = vector.broadcast %cst_17 : f32 to vector<16x32xf32>
    %34 = arith.maximumf %32, %33 : vector<16x32xf32>
    %c0_18 = arith.constant 0 : index
    %c0_19 = arith.constant 0 : index
    %35 = vector.load %arg7[%c0_18, %c0_19] : memref<16x96xf32, #tpu.memory_space<vmem>>, vector<16x32xf32>
    tpu.vector_store %arg7[%c0_18, %c0_19], %34 {strides = array<i32>} : memref<16x96xf32, #tpu.memory_space<vmem>>, vector<16x32xf32>,
    %c1 = arith.constant 1 : index
    %c0_20 = arith.constant 0 : index
    %c0_21 = arith.constant 0 : index
    %36 = vector.load %arg4[%c1, %c0_20, %c0_21] : memref<3x16x1xf32, #tpu.memory_space<vmem>>, vector<1x16x1xf32>
    %37 = vector.shape_cast %36 : vector<1x16x1xf32> to vector<16x1xf32>
    %c1_22 = arith.constant 1 : index
    %c0_23 = arith.constant 0 : index
    %c0_24 = arith.constant 0 : index
    %38 = vector.load %arg5[%c1_22, %c0_23, %c0_24] : memref<3x96x2xf32, #tpu.memory_space<vmem>>, vector<1x96x2xf32>
    %39 = vector.shape_cast %38 : vector<1x96x2xf32> to vector<96x2xf32>
    %cst_25 = arith.constant dense<0.000000e+00> : vector<16x2xf32>
    %40 = tpu.matmul %0, %39, %cst_25 {dimension_numbers = #tpu.dot_dimension_numbers<[1], [0], [0], [1], [0, 0, 1, 1], [], []>} : vector<16x96xf32>, vector<96x2xf32>, vector<16x2xf32> -> vector<16x2xf32>
    %41 = vector.extract_strided_slice %40 {offsets = [0, 0], sizes = [16, 1], strides = [1, 1]} : vector<16x2xf32> to vector<16x1xf32>
    %42 = vector.extract_strided_slice %40 {offsets = [0, 1], sizes = [16, 1], strides = [1, 1]} : vector<16x2xf32> to vector<16x1xf32>
    %43 = tpu.transpose %42, [1, 0] : vector<16x1xf32> -> vector<1x16xf32>
    %44 = vector.broadcast %41 : vector<16x1xf32> to vector<16x16xf32>
    %45 = vector.broadcast %43 : vector<1x16xf32> to vector<16x16xf32>
    %46 = arith.addf %44, %45 : vector<16x16xf32>
    %c1_26 = arith.constant 1 : index
    %47 = memref.load %arg1[%c1_26] : memref<3xf32, #tpu.memory_space<smem>>
    %48 = vector.broadcast %47 : f32 to vector<16x16xf32>
    %49 = arith.addf %46, %48 : vector<16x16xf32>
    %50 = math.tanh %49 : vector<16x16xf32>
    %c1_27 = arith.constant 1 : index
    %c0_28 = arith.constant 0 : index
    %c0_29 = arith.constant 0 : index
    %51 = vector.load %arg3[%c1_27, %c0_28, %c0_29] : memref<3x16x16xf32, #tpu.memory_space<vmem>>, vector<1x16x16xf32>
    %52 = vector.shape_cast %51 : vector<1x16x16xf32> to vector<16x16xf32>
    %53 = arith.mulf %52, %50 : vector<16x16xf32>
    %54 = arith.truncf %53 : vector<16x16xf32> to vector<16x16xbf16>
    %55 = vector.broadcast %37 : vector<16x1xf32> to vector<16x96xf32>
    %56 = arith.mulf %55, %0 : vector<16x96xf32>
    %57 = arith.truncf %56 : vector<16x96xf32> to vector<16x96xbf16>
    %cst_30 = arith.constant dense<0.000000e+00> : vector<16x96xf32>
    %58 = tpu.matmul %54, %57, %cst_30 {dimension_numbers = #tpu.dot_dimension_numbers<[1], [0], [0], [1], [0, 0, 1, 1], [], []>} : vector<16x16xbf16>, vector<16x96xbf16>, vector<16x96xf32> -> vector<16x96xf32>
    %59 = vector.broadcast %37 : vector<16x1xf32> to vector<16x96xf32>
    %60 = arith.mulf %59, %58 : vector<16x96xf32>
    %61 = vector.broadcast %1 : f32 to vector<16x96xf32>
    %62 = arith.mulf %61, %0 : vector<16x96xf32>
    %63 = arith.addf %62, %60 : vector<16x96xf32>
    %c1_31 = arith.constant 1 : index
    %c0_32 = arith.constant 0 : index
    %c0_33 = arith.constant 0 : index
    %64 = vector.load %arg6[%c1_31, %c0_32, %c0_33] : memref<3x96x32xf32, #tpu.memory_space<vmem>>, vector<1x96x32xf32>
    %65 = vector.shape_cast %64 : vector<1x96x32xf32> to vector<96x32xf32>
    %cst_34 = arith.constant dense<0.000000e+00> : vector<16x32xf32>
    %66 = tpu.matmul %63, %65, %cst_34 {dimension_numbers = #tpu.dot_dimension_numbers<[1], [0], [0], [1], [0, 0, 1, 1], [], []>} : vector<16x96xf32>, vector<96x32xf32>, vector<16x32xf32> -> vector<16x32xf32>
    %cst_35 = arith.constant 0.000000e+00 : f32
    %67 = vector.broadcast %cst_35 : f32 to vector<16x32xf32>
    %68 = arith.maximumf %66, %67 : vector<16x32xf32>
    %c0_36 = arith.constant 0 : index
    %c32 = arith.constant 32 : index
    %69 = vector.load %arg7[%c0_36, %c32] : memref<16x96xf32, #tpu.memory_space<vmem>>, vector<16x32xf32>
    tpu.vector_store %arg7[%c0_36, %c32], %68 {strides = array<i32>} : memref<16x96xf32, #tpu.memory_space<vmem>>, vector<16x32xf32>,
    %c2 = arith.constant 2 : index
    %c0_37 = arith.constant 0 : index
    %c0_38 = arith.constant 0 : index
    %70 = vector.load %arg4[%c2, %c0_37, %c0_38] : memref<3x16x1xf32, #tpu.memory_space<vmem>>, vector<1x16x1xf32>
    %71 = vector.shape_cast %70 : vector<1x16x1xf32> to vector<16x1xf32>
    %c2_39 = arith.constant 2 : index
    %c0_40 = arith.constant 0 : index
    %c0_41 = arith.constant 0 : index
    %72 = vector.load %arg5[%c2_39, %c0_40, %c0_41] : memref<3x96x2xf32, #tpu.memory_space<vmem>>, vector<1x96x2xf32>
    %73 = vector.shape_cast %72 : vector<1x96x2xf32> to vector<96x2xf32>
    %cst_42 = arith.constant dense<0.000000e+00> : vector<16x2xf32>
    %74 = tpu.matmul %0, %73, %cst_42 {dimension_numbers = #tpu.dot_dimension_numbers<[1], [0], [0], [1], [0, 0, 1, 1], [], []>} : vector<16x96xf32>, vector<96x2xf32>, vector<16x2xf32> -> vector<16x2xf32>
    %75 = vector.extract_strided_slice %74 {offsets = [0, 0], sizes = [16, 1], strides = [1, 1]} : vector<16x2xf32> to vector<16x1xf32>
    %76 = vector.extract_strided_slice %74 {offsets = [0, 1], sizes = [16, 1], strides = [1, 1]} : vector<16x2xf32> to vector<16x1xf32>
    %77 = tpu.transpose %76, [1, 0] : vector<16x1xf32> -> vector<1x16xf32>
    %78 = vector.broadcast %75 : vector<16x1xf32> to vector<16x16xf32>
    %79 = vector.broadcast %77 : vector<1x16xf32> to vector<16x16xf32>
    %80 = arith.addf %78, %79 : vector<16x16xf32>
    %c2_43 = arith.constant 2 : index
    %81 = memref.load %arg1[%c2_43] : memref<3xf32, #tpu.memory_space<smem>>
    %82 = vector.broadcast %81 : f32 to vector<16x16xf32>
    %83 = arith.addf %80, %82 : vector<16x16xf32>
    %84 = math.tanh %83 : vector<16x16xf32>
    %c2_44 = arith.constant 2 : index
    %c0_45 = arith.constant 0 : index
    %c0_46 = arith.constant 0 : index
    %85 = vector.load %arg3[%c2_44, %c0_45, %c0_46] : memref<3x16x16xf32, #tpu.memory_space<vmem>>, vector<1x16x16xf32>
    %86 = vector.shape_cast %85 : vector<1x16x16xf32> to vector<16x16xf32>
    %87 = arith.mulf %86, %84 : vector<16x16xf32>
    %88 = arith.truncf %87 : vector<16x16xf32> to vector<16x16xbf16>
    %89 = vector.broadcast %71 : vector<16x1xf32> to vector<16x96xf32>
    %90 = arith.mulf %89, %0 : vector<16x96xf32>
    %91 = arith.truncf %90 : vector<16x96xf32> to vector<16x96xbf16>
    %cst_47 = arith.constant dense<0.000000e+00> : vector<16x96xf32>
    %92 = tpu.matmul %88, %91, %cst_47 {dimension_numbers = #tpu.dot_dimension_numbers<[1], [0], [0], [1], [0, 0, 1, 1], [], []>} : vector<16x16xbf16>, vector<16x96xbf16>, vector<16x96xf32> -> vector<16x96xf32>
    %93 = vector.broadcast %71 : vector<16x1xf32> to vector<16x96xf32>
    %94 = arith.mulf %93, %92 : vector<16x96xf32>
    %95 = vector.broadcast %1 : f32 to vector<16x96xf32>
    %96 = arith.mulf %95, %0 : vector<16x96xf32>
    %97 = arith.addf %96, %94 : vector<16x96xf32>
    %c2_48 = arith.constant 2 : index
    %c0_49 = arith.constant 0 : index
    %c0_50 = arith.constant 0 : index
    %98 = vector.load %arg6[%c2_48, %c0_49, %c0_50] : memref<3x96x32xf32, #tpu.memory_space<vmem>>, vector<1x96x32xf32>
    %99 = vector.shape_cast %98 : vector<1x96x32xf32> to vector<96x32xf32>
    %cst_51 = arith.constant dense<0.000000e+00> : vector<16x32xf32>
    %100 = tpu.matmul %97, %99, %cst_51 {dimension_numbers = #tpu.dot_dimension_numbers<[1], [0], [0], [1], [0, 0, 1, 1], [], []>} : vector<16x96xf32>, vector<96x32xf32>, vector<16x32xf32> -> vector<16x32xf32>
    %cst_52 = arith.constant 0.000000e+00 : f32
    %101 = vector.broadcast %cst_52 : f32 to vector<16x32xf32>
    %102 = arith.maximumf %100, %101 : vector<16x32xf32>
    %c0_53 = arith.constant 0 : index
    %c64 = arith.constant 64 : index
    %103 = vector.load %arg7[%c0_53, %c64] : memref<16x96xf32, #tpu.memory_space<vmem>>, vector<16x32xf32>
    tpu.vector_store %arg7[%c0_53, %c64], %102 {strides = array<i32>} : memref<16x96xf32, #tpu.memory_space<vmem>>, vector<16x32xf32>,
    return
  }
}

</mosaic_0001>

<bundles_post_ra>
// kernel: _lambda_.7
= control target key start
LH: loop header
LB: loop body
LE: loop exit
PB: predicated region body
PF: predicated region fallthrough
CT: control target
= control target key end

     0   :  { %18 = vsyncpa [#allocation3], 0  ;;  %s680_s0 = inlined_call_operand.vmem [shape: f32[16,96], index: 0, kind: input, shape index: {}]   ;;  %s681_s1 = inlined_call_operand.vmem [shape: f32[16,32], index: 1, kind: input, shape index: {}]   ;;  %s682_s2 = inlined_call_operand.vmem [shape: f32[16,96], index: 2, kind: input, shape index: {}]   ;;  %s683_s3 = inlined_call_operand.vmem [shape: f32[16,16], index: 3, kind: input, shape index: {}]   ;;  %s684_s4 = inlined_call_operand.hbm [shape: f32[96,32], index: 4, kind: input, shape index: {}]   ;;  %s685_s5 = inlined_call_operand.hbm [shape: f32[32,32], index: 5, kind: input, shape index: {}]   ;;  %s686_s6 = inlined_call_operand.hbm [shape: f32[96,32], index: 6, kind: input, shape index: {}]   ;;  %s687_s7 = inlined_call_operand.hbm [shape: f32[16,32], index: 7, kind: input, shape index: {}]   ;;  %s688_s8 = inlined_call_operand.vmem [shape: f32[1,32], index: 8, kind: input, shape index: {}]   ;;  %s689_s9 = inlined_call_operand.hbm [shape: f32[32,4], index: 9, kind: input, shape index: {}]   ;;  %s690_s10 = inlined_call_operand.vmem [shape: f32[1,4], index: 10, kind: input, shape index: {}]   ;;  %s691_s11 = inlined_call_operand.hbm [shape: f32[16,32], index: 11, kind: output, shape index: {0}]   ;;  %s692_s12 = inlined_call_operand.vmem [shape: f32[16,4], index: 12, kind: output, shape index: {1}]  }
   0x1   :  { %19 = vsyncpa [#allocation6], 0 }
   0x2   :  { %20 = vsyncpa [#allocation9], 0 }
   0x3   :  { %21 = vsyncpa [#allocation4], 0  ;;  %s47_s23 = sshll.u32 %s685_s5, 4  ;;  %s527_s24 = smov [#allocation5]   ;;  %s48_s23 = int_to_ptr.hbm [resolvable:$true] %s47_s23 }
   0x4   :  { %s49_s25 = sshll.u32 %s527_s24, 4  ;;  %s73_s28 = sshll.u32 %s687_s7, 4  ;;  %s50_s25 = int_to_ptr.vmem [resolvable:$true] %s49_s25  ;;  %s74_s28 = int_to_ptr.hbm [resolvable:$true] %s73_s28 }
   0x5   :  { %s528_s29 = smov 128   ;;  %s529_s30 = smov 8  }
   0x6   :  { %55 = dma.hbm_to_vmem [thread:$0]  %s48_s23, 512, %s50_s25, [#allocation6], %s528_s29, %s528_s29, %s529_s30  }
   0x7   :  { %s530_s13 = smov [#allocation8]   ;;  %s34_s5 = sshll.u32 %s684_s4, 4  ;;  %s35_s5 = int_to_ptr.hbm [resolvable:$true] %s34_s5 }
   0x8   :  { %s75_s14 = sshll.u32 %s530_s13, 4  ;;  %s60_s18 = sshll.u32 %s686_s6, 4  ;;  %s76_s14 = int_to_ptr.vmem [resolvable:$true] %s75_s14  ;;  %s61_s18 = int_to_ptr.hbm [resolvable:$true] %s60_s18 }
   0x9   :  { %81 = dma.hbm_to_vmem [thread:$0]  %s74_s28, 256, %s76_s14, [#allocation9], %s528_s29, %s528_s29, %s529_s30  }
   0xa   :  { %s531_s19 = smov [#allocation2]   ;;  %s532_s21 = smov [#allocation7]  }
   0xb   :  { %s36_s20 = sshll.u32 %s531_s19, 4  ;;  %s62_s4 = sshll.u32 %s532_s21, 4  ;;  %s37_s20 = int_to_ptr.vmem [resolvable:$true] %s36_s20  ;;  %s63_s4 = int_to_ptr.vmem [resolvable:$true] %s62_s4 }
   0xc   :  { %42 = dma.hbm_to_vmem [thread:$0]  %s35_s5, 1536, %s37_s20, [#allocation3], %s528_s29, %s528_s29, %s529_s30  }
   0xd   :  { %s88_s24 = sshll.u32 %s689_s9, 4  ;;  %s533_s6 = smov [#allocation10]   ;;  %s89_s24 = int_to_ptr.hbm [resolvable:$true] %s88_s24 }
   0xe   :  { %68 = dma.hbm_to_vmem [thread:$0]  %s61_s18, 1536, %s63_s4, [#allocation6], %s528_s29, %s528_s29, %s529_s30  }
   0xf   :  { %s90_s25 = sshll.u32 %s533_s6, 4  ;;  %s91_s25 = int_to_ptr.vmem [resolvable:$true] %s90_s25 }
  0x10   :  { %96 = dma.hbm_to_vmem [thread:$0]  %s89_s24, 512, %s91_s25, [#allocation9], %s528_s29, %s528_s29, %s529_s30  }
  0x11   :  { %519 = dma.done.wait [#allocation3], 1536  }
  0x12   :  { %520 = vsyncadd [#allocation3], 4294965760 }
  0x13   :  { %521 = dma.done.wait [#allocation6], 2048  }
  0x14   :  { %522 = vsyncadd [#allocation6], 4294965248 }
  0x15   :  { %523 = dma.done.wait [#allocation9], 768  }
  0x16   :  { %524 = vsyncadd [#allocation9], 4294966528  ;;  %v212_v0 = vld [vmem:[#allocation7 + $0x58] sm:$0xff]  ;;  %v211_v1 = vld [vmem:[#allocation7 + $0x50] sm:$0xff]  ;;  %vm248_vm0 = vcmask 130048   ;;  %vm139_vm1 = vcmask 261120  }
  0x17   :  { %v132_v2 = vld [vmem:[#allocation2 + $0x58] sm:$0xff]  ;;  %223 = vmatpush.msra.mxu2 %v212_v0  ;;  %v131_v3 = vld [vmem:[#allocation2 + $0x50] sm:$0xff]  ;;  %v210_v4 = vld [vmem:[#allocation7 + $0x48] sm:$0xff]  ;;  %vm169_vm2 = vcmask 785408   ;;  %s336_s23 = sshll.u32 %s691_s11, 4  ;;  %vm327_vm3 = vcmask 31744   ;;  %s337_s23 = int_to_ptr.hbm [resolvable:$true] %s336_s23 }
  0x18   :  { %180 = vmatpush.msra.mxu1 %v132_v2  ;;  %v130_v5 = vld [vmem:[#allocation2 + $0x48] sm:$0xff]  ;;  %v209_v6 = vld [vmem:[#allocation7 + $0x40] sm:$0xff]  ;;  %v208_v8 = vld [vmem:[#allocation7 + $0x38] sm:$0xff] }
  0x19   :  { %224 = vmatpush.msra.mxu2 %v211_v1  ;;  %v129_v7 = vld [vmem:[#allocation2 + $0x40] sm:$0xff]  ;;  %v128_v9 = vld [vmem:[#allocation2 + $0x38] sm:$0xff]  ;;  %v137_v11 = vld [vmem:[#allocation5 + $0x10] sm:$0xff] }
  0x1a   :  { %181 = vmatpush.msra.mxu1 %v131_v3  ;;  %v138_v10 = vld [vmem:[#allocation5 + $0x18] sm:$0xff]  ;;  %v207_v12 = vld [vmem:[#allocation7 + $0x30] sm:$0xff]  ;;  %v247_v14 = vld [vmem:[#allocation8 + $0x8] sm:$0xff] }
  0x1b   :  { %225 = vmatpush.msra.mxu2 %v210_v4  ;;  %v127_v13 = vld [vmem:[#allocation2 + $0x30] sm:$0xff]  ;;  %158 = vmatpush.msra.mxu0 %v138_v10  ;;  %v136_v15 = vld [vmem:[#allocation5 + $0x8] sm:$0xff]  ;;  %v246_v16 = vld [vmem:[#allocation8] sm:$0xff] }
  0x1c   :  { %182 = vmatpush.msra.mxu1 %v130_v5  ;;  %v206_v17 = vld [vmem:[#allocation7 + $0x28] sm:$0xff]  ;;  %269 = vmatpush.msra.mxu3 %v247_v14  ;;  %v244_v19 = vld [vmem:[%s683_s3] sm:$0xff]  ;;  %v204_v25 = vld [vmem:[#allocation7 + $0x18] sm:$0xff] }
  0x1d   :  { %226 = vmatpush.msra.mxu2 %v209_v6  ;;  %v126_v18 = vld [vmem:[#allocation2 + $0x28] sm:$0xff]  ;;  %159 = vmatpush.msra.mxu0 %v137_v11  ;;  %v135_v20 = vld [vmem:[#allocation5] sm:$0xff]  ;;  %v124_v26 = vld [vmem:[#allocation2 + $0x18] sm:$0xff] }
  0x1e   :  { %183 = vmatpush.msra.mxu1 %v129_v7  ;;  %v205_v21 = vld [vmem:[#allocation7 + $0x20] sm:$0xff]  ;;  %270 = vmatpush.msra.mxu3 %v246_v16  ;;  %v293_v24 = vld [vmem:[#allocation10 + $0x18] sm:$0xff]  ;;  %v203_v28 = vld [vmem:[#allocation7 + $0x10] sm:$0xff] }
  0x1f   :  { %227 = vmatpush.msra.mxu2 %v208_v8  ;;  %v125_v22 = vld [vmem:[#allocation2 + $0x20] sm:$0xff]  ;;  %160 = vmatpush.msra.mxu0 %v136_v15  ;;  %v123_v29 = vld [vmem:[#allocation2 + $0x10] sm:$0xff]  ;;  %v202_v30 = vld [vmem:[#allocation7 + $0x8] sm:$0xff] }
  0x20   :  { %184 = vmatpush.msra.mxu1 %v128_v9  ;;  %v133_v23 = vld [vmem:[%s681_s1] sm:$0xff]  ;;  %361 = vmatmul.msk.f32.vlgmr.msra.gmra.mxu3 %vm248_vm0, %v244_v19  ;;  %v122_v31 = vld [vmem:[#allocation2 + $0x8] sm:$0xff]  ;;  %v291_v40 = vld [vmem:[#allocation10 + $0x8] sm:$0xff] }
  0x21   :  { %228 = vmatpush.msra.mxu2 %v207_v12  ;;  %161 = vmatpush.msra.mxu0 %v135_v20  ;;  %v292_v27 = vld [vmem:[#allocation10 + $0x10] sm:$0xff]  ;;  %v245_v32 = vld [vmem:[%s683_s3 + $0x8] sm:$0xff]  ;;  %v290_v41 = vld [vmem:[#allocation10] sm:$0xff] }
  0x22   :  { %185 = vmatpush.msra.mxu1 %v127_v13  ;;  %355 = vmatmul.msk.f32.vlgmr.msra.gmra.mxu0 %vm139_vm1, %v133_v23  ;;  %v201_v33 = vld [vmem:[#allocation7] sm:$0xff]  ;;  %v134_v37 = vld [vmem:[%s681_s1 + $0x8] sm:$0xff] }
  0x23   :  { %229 = vmatpush.msra.mxu2 %v206_v17  ;;  %316 = vmatpush.msrb.mxu3 %v293_v24  ;;  %v121_v34 = vld [vmem:[#allocation2] sm:$0xff]  ;;  %v200_v38 = vld [vmem:[%s682_s2 + $0x8] sm:$0xff] }
  0x24   :  { %186 = vmatpush.msra.mxu1 %v126_v18  ;;  %v199_v35 = vld [vmem:[%s682_s2] sm:$0xff]  ;;  %v120_v39 = vld [vmem:[%s680_s0 + $0x8] sm:$0xff] }
  0x25   :  { %230 = vmatpush.msra.mxu2 %v205_v21  ;;  %317 = vmatpush.msrb.mxu3 %v292_v27  ;;  %v119_v36 = vld [vmem:[%s680_s0] sm:$0xff]  ;;  %s534_s0 = smov [#allocation11]  }
  0x26   :  { %187 = vmatpush.msra.mxu1 %v125_v22  ;;  %v373_v48 = vld [vmem:[%s688_s8] ss:$0 sm:$0xff]  ;;  %s334_s2 = sshll.u32 %s534_s0, 4  ;;  %s335_s2 = int_to_ptr.vmem [resolvable:$true] %s334_s2 }
  0x27   :  { %231 = vmatpush.msra.mxu2 %v204_v25  ;;  %318 = vmatpush.msrb.mxu3 %v291_v40  ;;  %v374_v61 = vld [vmem:[%s690_s10] ss:$0 sm:$0xff] }
  0x28   :  { %188 = vmatpush.msra.mxu1 %v124_v26  ;;  %362 = vmatmul.msk.f32.gmra.mxu3 %vm248_vm0, %v245_v32 }
  0x29   :  { %232 = vmatpush.msra.mxu2 %v203_v28  ;;  %319 = vmatpush.msrb.mxu3 %v290_v41 }
  0x2a   :  { %189 = vmatpush.msra.mxu1 %v123_v29  ;;  %356 = vmatmul.msk.f32.gmra.mxu0 %vm139_vm1, %v134_v37 }
  0x2b   :  { %233 = vmatpush.msra.mxu2 %v202_v30 }
  0x2c   :  { %190 = vmatpush.msra.mxu1 %v122_v31 }
  0x2d   :  { %234 = vmatpush.msra.mxu2 %v201_v33 }
  0x2e   :  { %191 = vmatpush.msra.mxu1 %v121_v34  ;;  %359 = vmatmul.msk.f32.vlgmr.msra.gmra.mxu2 %vm169_vm2, %v199_v35 }
  0x2f   :  { %357 = vmatmul.msk.f32.vlgmr.msra.gmra.mxu1 %vm169_vm2, %v119_v36 }
  0x36   :  { %360 = vmatmul.msk.f32.gmra.mxu2 %vm169_vm2, %v200_v38 }
  0x37   :  { %358 = vmatmul.msk.f32.gmra.mxu1 %vm169_vm2, %v120_v39 }
  0x9f   :  { %v163_v42 = vpop.f32.mrf.mxu0 }
  0xa3   :  { %v272_v45 = vpop.f32.mrf.mxu3 }
  0xa7   :  { %v166_v49 = vpop.f32.mrf.mxu0 }
  0xab   :  { %v275_v56 = vpop.f32.mrf.mxu3 }
  0xac   :  { %v193_v43 = vpop.f32.mrf.mxu1 }
  0xad   :  { %v194_v44 = vadd.f32 %v193_v43, %v163_v42 }
  0xb1   :  { %v236_v46 = vpop.f32.mrf.mxu2 }
  0xb2   :  { %v242_v47 = vadd.f32 %v236_v46, %v194_v44 }
  0xb4   :  { %v196_v50 = vpop.f32.mrf.mxu1  ;;  %v278_v51 = vadd.f32 %v272_v45, %v242_v47 }
  0xb5   :  { %v197_v53 = vadd.f32 %v196_v50, %v166_v49 }
  0xb6   :  { %v284_v52 = vadd.f32 %v373_v48, %v278_v51 }
  0xb8   :  { %v288_v54 = vmax.f32 %v284_v52, 0.0  ;;  %286 = vst.msk [vmem:[#allocation11] sm:$0xff] %vm139_vm1, %v284_v52 }
  0xb9   :  { %v239_v55 = vpop.f32.mrf.mxu2 }
  0xba   :  { %v243_v57 = vadd.f32 %v239_v55, %v197_v53  ;;  %363 = vmatmul.msk.f32.vlgmr.msrb.gmra.mxu3 %vm139_vm1, %v288_v54 }
  0xbc   :  { %v279_v58 = vadd.f32 %v275_v56, %v243_v57 }
  0xbe   :  { %v285_v59 = vadd.f32 %v373_v48, %v279_v58 }
  0xc0   :  { %287 = vst.msk [vmem:[#allocation11 + $0x8] sm:$0xff] %vm139_vm1, %v285_v59  ;;  %v289_v60 = vmax.f32 %v285_v59, 0.0 }
  0xc1   :  { %342 = dma.vmem_to_hbm [thread:$0]  %s335_s2, 256, %s337_s23, [#allocation4], %s528_s29, %s528_s29, %s529_s30  }
  0xc2   :  { %364 = vmatmul.msk.f32.gmra.mxu3 %vm139_vm1, %v289_v60 }
 0x13d   :  { %v321_v62 = vpop.f32.mrf.mxu3 }
 0x13e   :  { %v322_v63 = vadd.f32 %v374_v61, %v321_v62 }
 0x140   :  { %328 = vst.msk [vmem:[%s692_s12] sm:$0xff] %vm327_vm3, %v322_v63 }
 0x145   :  { %v324_v0 = vpop.f32.mrf.mxu3 }
 0x146   :  { %v325_v1 = vadd.f32 %v374_v61, %v324_v0 }
 0x148   :  { %329 = vst.msk [vmem:[%s692_s12 + $0x8] sm:$0xff] %vm327_vm3, %v325_v1 }
 0x149   :  { %525 = dma.done.wait [#allocation4], 256  }
 0x14a   :  { %526 = vsyncadd [#allocation4], 4294967040 }
 0x14b   :  { %351 = vsyncpa [#allocation3], 1 }
 0x14c   :  { %352 = vsyncpa [#allocation6], 1 }
 0x14d   :  { %353 = vsyncpa [#allocation9], 1 }
 0x14e   :  { %354 = vsyncpa [#allocation4], 1 }

// kernel: _lambda_.4
= control target key start
LH: loop header
LB: loop body
LE: loop exit
PB: predicated region body
PF: predicated region fallthrough
CT: control target
= control target key end

     0   :  { %11 = vsyncpa [#allocation3], 0  ;;  %s240_s0 = inlined_call_operand.hbm [shape: f32[16,16], index: 0, kind: input, shape index: {}]   ;;  %s241_s1 = inlined_call_operand.vmem [shape: f32[16,32], index: 1, kind: input, shape index: {}]   ;;  %s242_s2 = inlined_call_operand.vmem [shape: f32[1,32], index: 2, kind: input, shape index: {}]   ;;  %s243_s3 = inlined_call_operand.vmem [shape: f32[16,16], index: 3, kind: output, shape index: {0}]   ;;  %s244_s4 = inlined_call_operand.hbm [shape: f32[16,32], index: 4, kind: output, shape index: {1}]   ;;  %s245_s5 = inlined_call_operand.vmem [shape: f32[16,32], index: 5, kind: output, shape index: {2}]  }
   0x1   :  { %12 = vsyncpa [#allocation4], 0  ;;  %s17_s20 = sshll.u32 %s240_s0, 4  ;;  %s173_s21 = smov [#allocation2]   ;;  %s18_s20 = int_to_ptr.hbm [resolvable:$true] %s17_s20 }
   0x2   :  { %s19_s22 = sshll.u32 %s173_s21, 4  ;;  %s174_s23 = smov 128   ;;  %s20_s22 = int_to_ptr.vmem [resolvable:$true] %s19_s22 }
   0x3   :  { %s175_s24 = smov 8  }
   0x4   :  { %25 = dma.hbm_to_vmem [thread:$0]  %s18_s20, 256, %s20_s22, [#allocation3], %s174_s23, %s174_s23, %s175_s24  }
   0x5   :  { %169 = dma.done.wait [#allocation3], 256  }
   0x6   :  { %170 = vsyncadd [#allocation3], 4294967040  ;;  %v44_v0 = vld [vmem:[%s241_s1 + $0x8] sm:$0xff]  ;;  %v43_v1 = vld [vmem:[%s241_s1] sm:$0xff]  ;;  %vm40_vm1 = vcmask 130048   ;;  %vm78_vm3 = vcmask 261120  }
   0x7   :  { %v34_v2 = vld [vmem:[#allocation2] sm:$0xff]  ;;  %69 = vmatpush.msra.mxu0 %v44_v0  ;;  %114 = vmatpush.msra.mxu1 %v44_v0  ;;  %v35_v3 = vld [vmem:[#allocation2 + $0x8] sm:$0xff]  ;;  %s176_s8 = smov [#allocation5]   ;;  %s93_s12 = sshll.u32 %s244_s4, 4  ;;  %s94_s12 = int_to_ptr.hbm [resolvable:$true] %s93_s12 }
   0x8   :  { %vm36_vm0 = vcmp.ne.f32.partialorder %v34_v2, %v34_v2  ;;  %vm37_vm2 = vcmp.ne.f32.partialorder %v35_v3, %v35_v3  ;;  %v120_v6 = vld [vmem:[%s242_s2] ss:$0 sm:$0xff]  ;;  %s91_s9 = sshll.u32 %s176_s8, 4  ;;  %s92_s9 = int_to_ptr.vmem [resolvable:$true] %s91_s9 }
   0x9   :  { %v38_v4 = vsel %vm36_vm0, 0.0, %v34_v2  ;;  %70 = vmatpush.msra.mxu0 %v43_v1  ;;  %115 = vmatpush.msra.mxu1 %v43_v1  ;;  %v39_v5 = vsel %vm37_vm2, 0.0, %v35_v3 }
   0xa   :  { %41 = vst.msk [vmem:[%s243_s3] sm:$0xff] %vm40_vm1, %v38_v4  ;;  %112 = vmatmul.msk.f32.vlgmr.msra.gmra.mxu0 %vm40_vm1, %v38_v4  ;;  %113 = vmatmul.msk.f32.vlgmr.msra.gmra.mxu1 %vm40_vm1, %v39_v5 }
   0xb   :  { %42 = vst.msk [vmem:[%s243_s3 + $0x8] sm:$0xff] %vm40_vm1, %v39_v5 }
  0x87   :  { %v72_v7 = vpop.f32.mrf.mxu0  ;;  %v75_v8 = vpop.f32.mrf.mxu1 }
  0x88   :  { %v73_v9 = vadd.f32 %v120_v6, %v72_v7  ;;  %v76_v10 = vadd.f32 %v120_v6, %v75_v8 }
  0x8a   :  { %79 = vst.msk [vmem:[#allocation5] sm:$0xff] %vm78_vm3, %v73_v9  ;;  %v81_v11 = vmax.f32 %v73_v9, 0.0  ;;  %v82_v12 = vmax.f32 %v76_v10, 0.0 }
  0x8b   :  { %80 = vst.msk [vmem:[#allocation5 + $0x8] sm:$0xff] %vm78_vm3, %v76_v10 }
  0x8c   :  { %83 = vst.msk [vmem:[%s245_s5] sm:$0xff] %vm78_vm3, %v81_v11 }
  0x8d   :  { %84 = vst.msk [vmem:[%s245_s5 + $0x8] sm:$0xff] %vm78_vm3, %v82_v12 }
  0x8e   :  { %99 = dma.vmem_to_hbm [thread:$0]  %s92_s9, 256, %s94_s12, [#allocation4], %s174_s23, %s174_s23, %s175_s24  }
  0x8f   :  { %171 = dma.done.wait [#allocation4], 256  }
  0x90   :  { %172 = vsyncadd [#allocation4], 4294967040 }
  0x91   :  { %110 = vsyncpa [#allocation3], 1 }
  0x92   :  { %111 = vsyncpa [#allocation4], 1 }

// kernel: _lambda_.5
= control target key start
LH: loop header
LB: loop body
LE: loop exit
PB: predicated region body
PF: predicated region fallthrough
CT: control target
= control target key end

     0   :  { %13 = vsyncpa [#allocation5], 0  ;;  %s950_s0 = inlined_call_operand.<no memory space> [shape: f32[1], index: 0, kind: input, shape index: {}]   ;;  %s951_s1 = inlined_call_operand.vmem [shape: f32[3], index: 1, kind: input, shape index: {}]   ;;  %s952_s2 = inlined_call_operand.vmem [shape: f32[16,32], index: 2, kind: input, shape index: {}]   ;;  %s953_s3 = inlined_call_operand.hbm [shape: f32[3,16,16], index: 3, kind: input, shape index: {}]   ;;  %s954_s4 = inlined_call_operand.hbm [shape: f32[3,16,1], index: 4, kind: input, shape index: {}]   ;;  %s955_s5 = inlined_call_operand.hbm [shape: f32[3,32,2], index: 5, kind: input, shape index: {}]   ;;  %s956_s6 = inlined_call_operand.hbm [shape: f32[3,32,32], index: 6, kind: input, shape index: {}]   ;;  %s957_s7 = inlined_call_operand.vmem [shape: f32[16,96], index: 7, kind: output, shape index: {}]  }
   0x1   :  { %14 = vsyncpa [#allocation4], 0 }
   0x2   :  { %15 = vsyncpa [#allocation8], 0 }
   0x3   :  { %16 = vsyncpa [#allocation11], 0  ;;  %s47_s26 = sshll.u32 %s954_s4, 4  ;;  %s802_s27 = smov [#allocation7]   ;;  %s48_s26 = int_to_ptr.hbm [resolvable:$true] %s47_s26 }
   0x4   :  { %s49_s28 = sshll.u32 %s802_s27, 4  ;;  %s24_s8 = sshll.u32 %s951_s1, 4  ;;  %s50_s28 = int_to_ptr.vmem [resolvable:$true] %s49_s28  ;;  %s25_s8 = int_to_ptr.vmem [resolvable:$true] %s24_s8 }
   0x5   :  { %s803_s9 = smov 128   ;;  %s804_s10 = smov 8  }
   0x6   :  { %55 = dma.hbm_to_vmem [thread:$0]  %s48_s26, 768, %s50_s28, [#allocation8], %s803_s9, %s803_s9, %s804_s10  }
   0x7   :  { %s805_s11 = smov [#allocation3]   ;;  %s34_s14 = sshll.u32 %s953_s3, 4  ;;  %s35_s14 = int_to_ptr.hbm [resolvable:$true] %s34_s14 }
   0x8   :  { %27 = dma.vmem_to_smem %s25_s8, 16, %s805_s11, [#allocation5]  }
   0x9   :  { %s806_s4 = smov [#allocation6]   ;;  %s60_s18 = sshll.u32 %s955_s5, 4  ;;  %s61_s18 = int_to_ptr.hbm [resolvable:$true] %s60_s18 }
   0xa   :  { %s36_s15 = sshll.u32 %s806_s4, 4  ;;  %s807_s1 = smov [#allocation9]   ;;  %s37_s15 = int_to_ptr.vmem [resolvable:$true] %s36_s15 }
   0xb   :  { %42 = dma.hbm_to_vmem [thread:$0]  %s35_s14, 768, %s37_s15, [#allocation4], %s803_s9, %s803_s9, %s804_s10  }
   0xc   :  { %s62_s19 = sshll.u32 %s807_s1, 4  ;;  %s73_s22 = sshll.u32 %s956_s6, 4  ;;  %s63_s19 = int_to_ptr.vmem [resolvable:$true] %s62_s19  ;;  %s74_s22 = int_to_ptr.hbm [resolvable:$true] %s73_s22 }
   0xd   :  { %68 = dma.hbm_to_vmem [thread:$0]  %s61_s18, 1536, %s63_s19, [#allocation8], %s803_s9, %s803_s9, %s804_s10  }
   0xe   :  { %s808_s3 = smov [#allocation10]  }
   0xf   :  { %s75_s23 = sshll.u32 %s808_s3, 4  ;;  %s76_s23 = int_to_ptr.vmem [resolvable:$true] %s75_s23 }
  0x10   :  { %81 = dma.hbm_to_vmem [thread:$0]  %s74_s22, 1536, %s76_s23, [#allocation11], %s803_s9, %s803_s9, %s804_s10  }
  0x11   :  { %794 = dma.done.wait [#allocation5], 16  }
  0x12   :  { %795 = vsyncadd [#allocation5], 4294967280 }
  0x13   :  { %796 = dma.done.wait [#allocation4], 768  }
  0x14   :  { %797 = vsyncadd [#allocation4], 4294966528 }
  0x15   :  { %798 = dma.done.wait [#allocation8], 2304  }
  0x16   :  { %799 = vsyncadd [#allocation8], 4294964992 }
  0x17   :  { %800 = dma.done.wait [#allocation11], 1536  }
  0x18   :  { %801 = vsyncadd [#allocation11], 4294965760 }
  0x19   :  { %102 = sfence }
  0x1a   :  { %v112_v0 = vld [vmem:[#allocation9 + $0x18] sm:$0xff]  ;;  %v111_v1 = vld [vmem:[#allocation9 + $0x10] sm:$0xff]  ;;  %v809_v3 = vmov 0   ;;  %v110_v4 = vld [vmem:[#allocation9 + $0x8] sm:$0xff]  ;;  %vm113_vm0 = vcmask 261120   ;;  %s810_s26 = smov 127   ;;  %v238_v50 = vstv %s950_s0 }
  0x1b   :  { %132 = vmatpush.msra.mxu0 %v112_v0  ;;  %v287_v2 = vld [vmem:[#allocation9 + $0x38] sm:$0xff]  ;;  %671 = vset.pattern.permute.xlu1 %v809_v3  ;;  %v286_v5 = vld [vmem:[#allocation9 + $0x30] sm:$0xff]  ;;  %v285_v6 = vld [vmem:[#allocation9 + $0x28] sm:$0xff]  ;;  %vm218_vm1 = vcmask 130048   ;;  %s645_s9 = sld [smem:[#allocation3 + $0x1]]  ;;  %s811_s11 = smov 32  }
  0x1c   :  { %300 = vmatpush.msra.mxu3 %v287_v2  ;;  %672 = vset.pattern.permute.xlu2 %v809_v3  ;;  %v109_v7 = vld [vmem:[#allocation9] sm:$0xff]  ;;  %v880_v10 = vld [vmem:[%s952_s2 + $0x8] sm:$0xff]  ;;  %v107_v15 = vld [vmem:[#allocation7] sm:$0xff]  ;;  %s651_s10 = sld [smem:[#allocation3 + $0x2]]  ;;  %vm452_vm2 = vcmask 523520   ;;  %s812_s15 = smov 64  }
  0x1d   :  { %133 = vmatpush.msra.mxu0 %v111_v1  ;;  %v871_v8 = vld [vmem:[%s952_s2] sm:$0xff]  ;;  %207 = vperm.xlu2 %672, %v107_v15   ;;  %v108_v16 = vld [vmem:[#allocation7 + $0x8] sm:$0xff]  ;;  %s194_s2 = sld [smem:[#allocation3]]  ;;  %v201_v37 = vld [vmem:[#allocation6 + $0x8] sm:$0xff]  ;;  %v905_v55 = vmul.f32 %v238_v50, %v880_v10  ;;  %vm627_vm3 = vcmask 785920  }
  0x1e   :  { %301 = vmatpush.msra.mxu3 %v286_v5  ;;  %v284_v9 = vld [vmem:[#allocation9 + $0x20] sm:$0xff]  ;;  %v246_v28 = vld [vmem:[#allocation10 + $0x18] sm:$0xff]  ;;  %v245_v43 = vld [vmem:[#allocation10 + $0x10] sm:$0xff]  ;;  %v900_v51 = vmul.f32 %v238_v50, %v871_v8 }
  0x1f   :  { %134 = vmatpush.msra.mxu0 %v110_v4  ;;  %265 = vmatpush.msra.mxu2 %v246_v28  ;;  %v200_v36 = vld [vmem:[#allocation6] sm:$0xff]  ;;  %v244_v44 = vld [vmem:[#allocation10 + $0x8] sm:$0xff]  ;;  %v462_v46 = vld [vmem:[#allocation9 + $0x58] sm:$0xff] }
  0x20   :  { %302 = vmatpush.msra.mxu3 %v285_v6  ;;  %v243_v45 = vld [vmem:[#allocation10] sm:$0xff]  ;;  %v461_v47 = vld [vmem:[#allocation9 + $0x50] sm:$0xff]  ;;  %v460_v48 = vld [vmem:[#allocation9 + $0x48] sm:$0xff] }
  0x21   :  { %135 = vmatpush.msra.mxu0 %v109_v7  ;;  %266 = vmatpush.msra.mxu2 %v245_v43  ;;  %v459_v49 = vld [vmem:[#allocation9 + $0x40] sm:$0xff]  ;;  %v456_v2 = vld [vmem:[#allocation7 + $0x20] sm:$0xff]  ;;  %v457_v4 = vld [vmem:[#allocation7 + $0x28] sm:$0xff] }
  0x22   :  { %638 = vmatmul.msk.f32.vlgmr.msra.gmra.mxu0 %vm113_vm0, %v871_v8  ;;  %303 = vmatpush.msra.mxu3 %v284_v9  ;;  %v281_v0 = vld [vmem:[#allocation7 + $0x10] sm:$0xff]  ;;  %v412_v9 = vld [vmem:[#allocation10 + $0x38] sm:$0xff] }
  0x23   :  { %643 = vmatmul.msk.f32.vlgmr.msra.gmra.mxu3 %vm113_vm0, %v871_v8  ;;  %v195_v31 = vstv %s194_s2  ;;  %267 = vmatpush.msra.mxu2 %v244_v44 }
  0x24   :  { %431 = vmatpush.msrb.mxu0 %v412_v9 }
  0x25   :  { %212 = vperm.xlu2 %672, %v108_v16   ;;  %268 = vmatpush.msra.mxu2 %v243_v45  ;;  %v538_v45 = vstv %s651_s10 }
  0x27   :  { %475 = vmatpush.msrb.mxu2 %v462_v46 }
  0x29   :  { %476 = vmatpush.msrb.mxu2 %v461_v47 }
  0x2a   :  { %639 = vmatmul.msk.f32.gmra.mxu0 %vm113_vm0, %v880_v10 }
  0x2b   :  { %644 = vmatmul.msk.f32.gmra.mxu3 %vm113_vm0, %v880_v10  ;;  %477 = vmatpush.msrb.mxu2 %v460_v48 }
  0x2d   :  { %478 = vmatpush.msrb.mxu2 %v459_v49 }
  0x77   :  { %v208_v23 = vpop.permute.xlu2 %207 }
  0x78   :  { %v215_v24 = vmul.f32 %v208_v23, %v871_v8 }
  0x7f   :  { %v213_v25 = vpop.permute.xlu2 %212 }
  0x80   :  { %v216_v26 = vmul.f32 %v213_v25, %v880_v10 }
  0x82   :  { %v217_v27 = vpack.c.bf16 %v216_v26, %v215_v24 }
  0x84   :  { %229 = vmatpush.bf16.msra.mxu1 %v217_v27 }
  0x9f   :  { %v137_v11 = vpop.f32.mrf.mxu0 }
  0xa0   :  { %184 = vperm.xlu1 %671, %v137_v11   ;;  %145 = vrot.lane.b32.xlu0 %v137_v11, %s810_s26  ;;  %v411_v11 = vld [vmem:[#allocation10 + $0x30] sm:$0xff] }
  0xa1   :  { %432 = vmatpush.msrb.mxu0 %v411_v11 }
  0xa6   :  { %v305_v13 = vpop.f32.mrf.mxu3 }
  0xa7   :  { %v140_v12 = vpop.f32.mrf.mxu0 }
  0xa8   :  { %188 = vperm.xlu1 %671, %v140_v12   ;;  %147 = vrot.lane.b32.xlu0 %v140_v12, %s810_s26 }
  0xae   :  { %v889_v14 = vpop.f32.mrf.mxu3 }
  0xb0   :  { %313 = vrot.lane.b32.xlu1 %v305_v13, %s810_s26 }
  0xb8   :  { %315 = vrot.lane.b32.xlu1 %v889_v14, %s810_s26 }
  0xc0   :  { %352 = vperm.xlu1 %671, %v305_v13  }
 0x112   :  { %v185_v17 = vpop.permute.xlu1 %184  ;;  %v146_v18 = vpop.permute.xlu0 %145 }
 0x113   :  { %151 = vxpose.xlu0.b32.start [1/2] (short) (narrow) %v146_v18, 8 }
 0x11a   :  { %v189_v19 = vpop.permute.xlu1 %188  ;;  %v148_v20 = vpop.permute.xlu0 %147 }
 0x11b   :  { %152 = vxpose.xlu0.b32.end [2/2] (short) (narrow) %v148_v20, 8 }
 0x122   :  { %v314_v21 = vpop.permute.xlu1 %313 }
 0x123   :  { %319 = vxpose.xlu0.b32.start [1/2] (short) (narrow) %v314_v21, 8 }
 0x12a   :  { %v316_v22 = vpop.permute.xlu1 %315 }
 0x12b   :  { %320 = vxpose.xlu0.b32.end [2/2] (short) (narrow) %v316_v22, 8 }
 0x132   :  { %v353_v13 = vpop.permute.xlu1 %352 }
 0x192   :  { %673 = vset.pattern.permute.xlu0 %v809_v3  ;;  %v282_v3 = vld [vmem:[#allocation7 + $0x18] sm:$0xff] }
 0x1b7   :  { %v167_v29 = vpop.trf.xlu0 }
 0x1b8   :  { %v191_v30 = vperm.slane %v167_v29, 0  ;;  %v369_v29 = vld [vmem:[#allocation6 + $0x10] sm:$0xff] }
 0x1ba   :  { %v192_v32 = vadd.f32 %v191_v30, %v185_v17  ;;  %v193_v33 = vadd.f32 %v191_v30, %v189_v19  ;;  %v363_v17 = vstv %s645_s9 }
 0x1bc   :  { %v196_v34 = vadd.f32 %v195_v31, %v192_v32  ;;  %v197_v35 = vadd.f32 %v195_v31, %v193_v33 }
 0x1be   :  { %674 = vtanh.f32 %v196_v34 }
 0x1bf   :  { %676 = vtanh.f32 %v197_v35 }
 0x1c4   :  { %v675_v38 = vpop.eup %674 }
 0x1c5   :  { %v677_v39 = vpop.eup %676  ;;  %v202_v40 = vmul.f32 %v675_v38, %v200_v36 }
 0x1c6   :  { %v203_v41 = vmul.f32 %v677_v39, %v201_v37  ;;  %v410_v39 = vld [vmem:[#allocation10 + $0x28] sm:$0xff] }
 0x1c7   :  { %v335_v7 = vpop.trf.xlu0  ;;  %433 = vmatpush.msrb.mxu0 %v410_v39 }
 0x1c8   :  { %v204_v42 = vpack.c.bf16 %v203_v41, %v202_v40  ;;  %v359_v12 = vperm.slane %v335_v7, 0  ;;  %v409_v40 = vld [vmem:[#allocation10 + $0x20] sm:$0xff] }
 0x1c9   :  { %434 = vmatpush.msrb.mxu0 %v409_v40 }
 0x1ca   :  { %640 = vmatmul.msk.bf16.vlgmr.msra.gmra.mxu1 %vm218_vm1, %v204_v42 }
 0x247   :  { %v231_v52 = vpop.f32.mrf.mxu1 }
 0x248   :  { %v236_v53 = vmul.f32 %v231_v52, %v208_v23  ;;  %v370_v23 = vld [vmem:[#allocation6 + $0x18] sm:$0xff] }
 0x24a   :  { %v241_v54 = vadd.f32 %v900_v51, %v236_v53  ;;  %v544_v53 = vld [vmem:[#allocation6 + $0x20] sm:$0xff] }
 0x24c   :  { %641 = vmatmul.msk.f32.vlgmr.msra.gmra.mxu2 %vm113_vm0, %v241_v54  ;;  %v545_v54 = vld [vmem:[#allocation6 + $0x28] sm:$0xff] }
 0x24f   :  { %v233_v56 = vpop.f32.mrf.mxu1 }
 0x250   :  { %v237_v57 = vmul.f32 %v233_v56, %v213_v25 }
 0x252   :  { %v242_v58 = vadd.f32 %v905_v55, %v237_v57 }
 0x254   :  { %642 = vmatmul.msk.f32.gmra.mxu2 %vm113_vm0, %v242_v58 }
 0x25c   :  { %649 = vmatmul.msk.f32.vlgmr.msrb.gmra.mxu2 %vm113_vm0, %v871_v8 }
 0x264   :  { %650 = vmatmul.msk.f32.gmra.mxu2 %vm113_vm0, %v880_v10 }
 0x2cf   :  { %v270_v59 = vpop.f32.mrf.mxu2 }
 0x2d0   :  { %v276_v60 = vmax.f32 %v270_v59, 0.0 }
 0x2d2   :  { %278 = vst.msk [vmem:[%s957_s7] sm:$0xff] %vm113_vm0, %v276_v60 }
 0x2d7   :  { %v273_v61 = vpop.f32.mrf.mxu2 }
 0x2d8   :  { %v277_v62 = vmax.f32 %v273_v61, 0.0  ;;  %v587_v61 = vld [vmem:[#allocation10 + $0x58] sm:$0xff] }
 0x2d9   :  { %606 = vmatpush.msra.mxu0 %v587_v61 }
 0x2da   :  { %279 = vst.msk [vmem:[%s957_s7 + $0x8] sm:$0xff] %vm113_vm0, %v277_v62  ;;  %v586_v62 = vld [vmem:[#allocation10 + $0x50] sm:$0xff] }
 0x2db   :  { %607 = vmatpush.msra.mxu0 %v586_v62 }
 0x2df   :  { %v480_v63 = vpop.f32.mrf.mxu2 }
 0x2e0   :  { %527 = vperm.xlu1 %671, %v480_v63   ;;  %488 = vrot.lane.b32.xlu2 %v480_v63, %s810_s26  ;;  %v585_v63 = vld [vmem:[#allocation10 + $0x48] sm:$0xff] }
 0x2e1   :  { %608 = vmatpush.msra.mxu0 %v585_v63 }
 0x2e7   :  { %v483_v1 = vpop.f32.mrf.mxu2 }
 0x2e8   :  { %376 = vperm.xlu1 %671, %v281_v0   ;;  %490 = vrot.lane.b32.xlu2 %v483_v1, %s810_s26  ;;  %v584_v0 = vld [vmem:[#allocation10 + $0x40] sm:$0xff] }
 0x2e9   :  { %609 = vmatpush.msra.mxu0 %v584_v0 }
 0x2f0   :  { %551 = vperm.xlu1 %671, %v456_v2   ;;  %356 = vperm.xlu2 %672, %v889_v14   ;;  %v360_v14 = vadd.f32 %v359_v12, %v353_v13 }
 0x2f2   :  { %v364_v19 = vadd.f32 %v363_v17, %v360_v14 }
 0x2f8   :  { %381 = vperm.xlu2 %672, %v282_v3  }
 0x300   :  { %531 = vperm.xlu2 %672, %v483_v1  }
 0x308   :  { %556 = vperm.xlu2 %672, %v457_v4  }
 0x33a   :  { %v489_v5 = vpop.permute.xlu2 %488 }
 0x33b   :  { %494 = vxpose.xlu1.b32.start [1/2] (short) (narrow) %v489_v5, 8 }
 0x342   :  { %v491_v6 = vpop.permute.xlu2 %490 }
 0x343   :  { %495 = vxpose.xlu1.b32.end [2/2] (short) (narrow) %v491_v6, 8 }
 0x34a   :  { %v357_v15 = vpop.permute.xlu2 %356 }
 0x34b   :  { %v361_v16 = vadd.f32 %v359_v12, %v357_v15 }
 0x34d   :  { %v365_v18 = vadd.f32 %v363_v17, %v361_v16 }
 0x34f   :  { %678 = vtanh.f32 %v365_v18 }
 0x350   :  { %680 = vtanh.f32 %v364_v19 }
 0x352   :  { %v528_v20 = vpop.permute.xlu1 %527  ;;  %v382_v21 = vpop.permute.xlu2 %381 }
 0x353   :  { %v385_v27 = vmul.f32 %v382_v21, %v880_v10 }
 0x355   :  { %v679_v22 = vpop.eup %678 }
 0x356   :  { %v681_v26 = vpop.eup %680  ;;  %v372_v30 = vmul.f32 %v679_v22, %v370_v23 }
 0x357   :  { %v371_v32 = vmul.f32 %v681_v26, %v369_v29 }
 0x359   :  { %v373_v33 = vpack.c.bf16 %v372_v30, %v371_v32 }
 0x35a   :  { %v377_v24 = vpop.permute.xlu1 %376  ;;  %v532_v25 = vpop.permute.xlu2 %531 }
 0x35b   :  { %v384_v28 = vmul.f32 %v377_v24, %v871_v8 }
 0x35d   :  { %v386_v31 = vpack.c.bf16 %v385_v27, %v384_v28 }
 0x35f   :  { %397 = vmatpush.bf16.msrb.mxu1 %v386_v31 }
 0x362   :  { %v552_v34 = vpop.permute.xlu1 %551  ;;  %v557_v35 = vpop.permute.xlu2 %556  ;;  %646 = vmatmul.msk.bf16.vlgmr.msrb.gmra.mxu1 %vm218_vm1, %v373_v33 }
 0x363   :  { %v559_v36 = vmul.f32 %v552_v34, %v871_v8  ;;  %v560_v37 = vmul.f32 %v557_v35, %v880_v10  ;;  %655 = vmatpush.msra.mxu1 %v587_v61 }
 0x365   :  { %v561_v38 = vpack.c.bf16 %v560_v37, %v559_v36  ;;  %656 = vmatpush.msra.mxu1 %v586_v62 }
 0x367   :  { %572 = vmatpush.bf16.msrb.mxu3 %v561_v38  ;;  %657 = vmatpush.msra.mxu1 %v585_v63 }
 0x369   :  { %658 = vmatpush.msra.mxu1 %v584_v0 }
 0x3df   :  { %v510_v41 = vpop.trf.xlu1  ;;  %v399_v42 = vpop.f32.mrf.mxu1 }
 0x3e0   :  { %v534_v43 = vperm.slane %v510_v41, 0  ;;  %v404_v44 = vmul.f32 %v399_v42, %v377_v24 }
 0x3e2   :  { %v535_v46 = vadd.f32 %v534_v43, %v528_v20  ;;  %v536_v47 = vadd.f32 %v534_v43, %v532_v25  ;;  %v406_v48 = vadd.f32 %v404_v44, %v900_v51 }
 0x3e4   :  { %v539_v49 = vadd.f32 %v538_v45, %v535_v46  ;;  %v540_v8 = vadd.f32 %v538_v45, %v536_v47  ;;  %647 = vmatmul.msk.f32.vlgmr.msrb.gmra.mxu0 %vm113_vm0, %v406_v48 }
 0x3e6   :  { %682 = vtanh.f32 %v539_v49 }
 0x3e7   :  { %684 = vtanh.f32 %v540_v8  ;;  %v401_v10 = vpop.f32.mrf.mxu1 }
 0x3e8   :  { %v405_v50 = vmul.f32 %v401_v10, %v382_v21 }
 0x3ea   :  { %v407_v52 = vadd.f32 %v405_v50, %v905_v55 }
 0x3ec   :  { %v683_v56 = vpop.eup %682  ;;  %648 = vmatmul.msk.f32.gmra.mxu0 %vm113_vm0, %v407_v52 }
 0x3ed   :  { %v685_v57 = vpop.eup %684  ;;  %v546_v58 = vmul.f32 %v683_v56, %v544_v53 }
 0x3ee   :  { %v547_v59 = vmul.f32 %v685_v57, %v545_v54 }
 0x3f0   :  { %v548_v60 = vpack.c.bf16 %v547_v59, %v546_v58 }
 0x3f2   :  { %652 = vmatmul.msk.bf16.vlgmr.msrb.gmra.mxu3 %vm218_vm1, %v548_v60 }
 0x461   :  { %v436_v1 = vpop.f32.mrf.mxu0 }
 0x462   :  { %v442_v2 = vmax.f32 %v436_v1, 0.0 }
 0x464   :  { %446 = vrot.lane.b32.xlu2 %v442_v2, %s811_s11 }
 0x469   :  { %v439_v3 = vpop.f32.mrf.mxu0 }
 0x46a   :  { %v443_v4 = vmax.f32 %v439_v3, 0.0 }
 0x46c   :  { %448 = vrot.lane.b32.xlu2 %v443_v4, %s811_s11 }
 0x475   :  { %v574_v5 = vpop.f32.mrf.mxu3 }
 0x476   :  { %v579_v6 = vmul.f32 %v574_v5, %v552_v34 }
 0x478   :  { %v581_v7 = vadd.f32 %v579_v6, %v900_v51 }
 0x47a   :  { %653 = vmatmul.msk.f32.vlgmr.msra.gmra.mxu0 %vm113_vm0, %v581_v7 }
 0x47d   :  { %v576_v9 = vpop.f32.mrf.mxu3 }
 0x47e   :  { %v580_v11 = vmul.f32 %v576_v9, %v557_v35 }
 0x480   :  { %v582_v12 = vadd.f32 %v580_v11, %v905_v55 }
 0x482   :  { %654 = vmatmul.msk.f32.vlgmr.msra.gmra.mxu1 %vm113_vm0, %v582_v12 }
 0x4be   :  { %v447_v13 = vpop.permute.xlu2 %446 }
 0x4bf   :  { %453 = vst.msk [vmem:[%s957_s7] sm:$0xff] %vm452_vm2, %v447_v13 }
 0x4c6   :  { %v449_v15 = vpop.permute.xlu2 %448 }
 0x4c7   :  { %454 = vst.msk [vmem:[%s957_s7 + $0x8] sm:$0xff] %vm452_vm2, %v449_v15 }
 0x4f7   :  { %v611_v51 = vpop.f32.mrf.mxu0 }
 0x4f8   :  { %v617_v16 = vmax.f32 %v611_v51, 0.0 }
 0x4fa   :  { %621 = vrot.lane.b32.xlu0 %v617_v16, %s812_s15 }
 0x4ff   :  { %v614_v14 = vpop.f32.mrf.mxu1 }
 0x500   :  { %v618_v17 = vmax.f32 %v614_v14, 0.0 }
 0x502   :  { %623 = vrot.lane.b32.xlu2 %v618_v17, %s812_s15 }
 0x55c   :  { %v624_v55 = vpop.permute.xlu2 %623 }
 0x55d   :  { %629 = vst.msk [vmem:[%s957_s7 + $0x8] sm:$0xff] %vm627_vm3, %v624_v55 }
 0x56c   :  { %v622_v18 = vpop.permute.xlu0 %621 }
 0x56d   :  { %628 = vst.msk [vmem:[%s957_s7] sm:$0xff] %vm627_vm3, %v622_v18 }
 0x56e   :  { %634 = vsyncpa [#allocation4], 1 }
 0x56f   :  { %635 = vsyncpa [#allocation8], 1 }
 0x570   :  { %636 = vsyncpa [#allocation11], 1 }
 0x571   :  { %637 = vsyncpa [#allocation5], 1 }

// kernel: _lambda_.6
= control target key start
LH: loop header
LB: loop body
LE: loop exit
PB: predicated region body
PF: predicated region fallthrough
CT: control target
= control target key end

     0   :  { %13 = vsyncpa [#allocation5], 0  ;;  %s1014_s0 = inlined_call_operand.<no memory space> [shape: f32[1], index: 0, kind: input, shape index: {}]   ;;  %s1015_s1 = inlined_call_operand.vmem [shape: f32[3], index: 1, kind: input, shape index: {}]   ;;  %s1016_s2 = inlined_call_operand.vmem [shape: f32[16,96], index: 2, kind: input, shape index: {}]   ;;  %s1017_s3 = inlined_call_operand.hbm [shape: f32[3,16,16], index: 3, kind: input, shape index: {}]   ;;  %s1018_s4 = inlined_call_operand.hbm [shape: f32[3,16,1], index: 4, kind: input, shape index: {}]   ;;  %s1019_s5 = inlined_call_operand.hbm [shape: f32[3,96,2], index: 5, kind: input, shape index: {}]   ;;  %s1020_s6 = inlined_call_operand.hbm [shape: f32[3,96,32], index: 6, kind: input, shape index: {}]   ;;  %s1021_s7 = inlined_call_operand.vmem [shape: f32[16,96], index: 7, kind: output, shape index: {}]  }
   0x1   :  { %14 = vsyncpa [#allocation4], 0 }
   0x2   :  { %15 = vsyncpa [#allocation8], 0 }
   0x3   :  { %16 = vsyncpa [#allocation11], 0  ;;  %s47_s26 = sshll.u32 %s1018_s4, 4  ;;  %s847_s27 = smov [#allocation7]   ;;  %s48_s26 = int_to_ptr.hbm [resolvable:$true] %s47_s26 }
   0x4   :  { %s49_s28 = sshll.u32 %s847_s27, 4  ;;  %s24_s8 = sshll.u32 %s1015_s1, 4  ;;  %s50_s28 = int_to_ptr.vmem [resolvable:$true] %s49_s28  ;;  %s25_s8 = int_to_ptr.vmem [resolvable:$true] %s24_s8 }
   0x5   :  { %s848_s9 = smov 128   ;;  %s849_s10 = smov 8  }
   0x6   :  { %55 = dma.hbm_to_vmem [thread:$0]  %s48_s26, 768, %s50_s28, [#allocation8], %s848_s9, %s848_s9, %s849_s10  }
   0x7   :  { %s850_s11 = smov [#allocation3]   ;;  %s34_s14 = sshll.u32 %s1017_s3, 4  ;;  %s35_s14 = int_to_ptr.hbm [resolvable:$true] %s34_s14 }
   0x8   :  { %27 = dma.vmem_to_smem %s25_s8, 16, %s850_s11, [#allocation5]  }
   0x9   :  { %s851_s4 = smov [#allocation6]   ;;  %s60_s18 = sshll.u32 %s1019_s5, 4  ;;  %s61_s18 = int_to_ptr.hbm [resolvable:$true] %s60_s18 }
   0xa   :  { %s36_s15 = sshll.u32 %s851_s4, 4  ;;  %s852_s1 = smov [#allocation9]   ;;  %s37_s15 = int_to_ptr.vmem [resolvable:$true] %s36_s15 }
   0xb   :  { %42 = dma.hbm_to_vmem [thread:$0]  %s35_s14, 768, %s37_s15, [#allocation4], %s848_s9, %s848_s9, %s849_s10  }
   0xc   :  { %s62_s19 = sshll.u32 %s852_s1, 4  ;;  %s73_s22 = sshll.u32 %s1020_s6, 4  ;;  %s63_s19 = int_to_ptr.vmem [resolvable:$true] %s62_s19  ;;  %s74_s22 = int_to_ptr.hbm [resolvable:$true] %s73_s22 }
   0xd   :  { %68 = dma.hbm_to_vmem [thread:$0]  %s61_s18, 4608, %s63_s19, [#allocation8], %s848_s9, %s848_s9, %s849_s10  }
   0xe   :  { %s853_s3 = smov [#allocation10]  }
   0xf   :  { %s75_s23 = sshll.u32 %s853_s3, 4  ;;  %s76_s23 = int_to_ptr.vmem [resolvable:$true] %s75_s23 }
  0x10   :  { %81 = dma.hbm_to_vmem [thread:$0]  %s74_s22, 4608, %s76_s23, [#allocation11], %s848_s9, %s848_s9, %s849_s10  }
  0x11   :  { %839 = dma.done.wait [#allocation5], 16  }
  0x12   :  { %840 = vsyncadd [#allocation5], 4294967280 }
  0x13   :  { %841 = dma.done.wait [#allocation4], 768  }
  0x14   :  { %842 = vsyncadd [#allocation4], 4294966528 }
  0x15   :  { %843 = dma.done.wait [#allocation8], 5376  }
  0x16   :  { %844 = vsyncadd [#allocation8], 4294961920 }
  0x17   :  { %845 = dma.done.wait [#allocation11], 4608  }
  0x18   :  { %846 = vsyncadd [#allocation11], 4294962688 }
  0x19   :  { %102 = sfence }
  0x1a   :  { %v120_v0 = vld [vmem:[#allocation9 + $0x58] sm:$0xff]  ;;  %v119_v1 = vld [vmem:[#allocation9 + $0x50] sm:$0xff]  ;;  %v118_v2 = vld [vmem:[#allocation9 + $0x48] sm:$0xff]  ;;  %vm121_vm0 = vcmask 785408   ;;  %v854_v28 = vmov 0   ;;  %s202_s26 = sld [smem:[#allocation3]] }
  0x1b   :  { %132 = vmatpush.msra.mxu0 %v120_v0  ;;  %v117_v3 = vld [vmem:[#allocation9 + $0x40] sm:$0xff]  ;;  %v312_v4 = vld [vmem:[#allocation9 + $0xb8] sm:$0xff]  ;;  %v311_v5 = vld [vmem:[#allocation9 + $0xb0] sm:$0xff]  ;;  %716 = vset.pattern.permute.xlu1 %v854_v28  ;;  %vm226_vm1 = vcmask 130048   ;;  %s694_s27 = sld [smem:[#allocation3 + $0x1]]  ;;  %vm294_vm2 = vcmask 261120  }
  0x1c   :  { %317 = vmatpush.msra.mxu3 %v312_v4  ;;  %v116_v6 = vld [vmem:[#allocation9 + $0x38] sm:$0xff]  ;;  %v310_v7 = vld [vmem:[#allocation9 + $0xa8] sm:$0xff]  ;;  %v115_v8 = vld [vmem:[#allocation9 + $0x30] sm:$0xff]  ;;  %717 = vset.pattern.permute.xlu2 %v854_v28  ;;  %s700_s28 = sld [smem:[#allocation3 + $0x2]]  ;;  %s856_s11 = smov 32   ;;  %vm485_vm3 = vcmask 523520  }
  0x1d   :  { %133 = vmatpush.msra.mxu0 %v119_v1  ;;  %v309_v9 = vld [vmem:[#allocation9 + $0xa0] sm:$0xff]  ;;  %v114_v10 = vld [vmem:[#allocation9 + $0x28] sm:$0xff]  ;;  %v308_v11 = vld [vmem:[#allocation9 + $0x98] sm:$0xff]  ;;  %s857_s15 = smov 64   ;;  %vm676_vm4 = vcmask 785920  }
  0x1e   :  { %318 = vmatpush.msra.mxu3 %v311_v5  ;;  %v113_v12 = vld [vmem:[#allocation9 + $0x20] sm:$0xff]  ;;  %v307_v13 = vld [vmem:[#allocation9 + $0x90] sm:$0xff]  ;;  %v112_v14 = vld [vmem:[#allocation9 + $0x18] sm:$0xff] }
  0x1f   :  { %134 = vmatpush.msra.mxu0 %v118_v2  ;;  %v306_v15 = vld [vmem:[#allocation9 + $0x88] sm:$0xff]  ;;  %v111_v16 = vld [vmem:[#allocation9 + $0x10] sm:$0xff]  ;;  %v305_v17 = vld [vmem:[#allocation9 + $0x80] sm:$0xff] }
  0x20   :  { %319 = vmatpush.msra.mxu3 %v310_v7  ;;  %v110_v18 = vld [vmem:[#allocation9 + $0x8] sm:$0xff]  ;;  %v304_v19 = vld [vmem:[#allocation9 + $0x78] sm:$0xff]  ;;  %v109_v20 = vld [vmem:[#allocation9] sm:$0xff] }
  0x21   :  { %135 = vmatpush.msra.mxu0 %v117_v3  ;;  %v303_v21 = vld [vmem:[#allocation9 + $0x70] sm:$0xff]  ;;  %v916_v22 = vld [vmem:[%s1016_s2] sm:$0xff]  ;;  %v503_v23 = vld [vmem:[#allocation9 + $0x118] sm:$0xff] }
  0x22   :  { %320 = vmatpush.msra.mxu3 %v309_v9  ;;  %v302_v24 = vld [vmem:[#allocation9 + $0x68] sm:$0xff]  ;;  %v502_v25 = vld [vmem:[#allocation9 + $0x110] sm:$0xff]  ;;  %v301_v26 = vld [vmem:[#allocation9 + $0x60] sm:$0xff] }
  0x23   :  { %136 = vmatpush.msra.mxu0 %v116_v6  ;;  %v501_v27 = vld [vmem:[#allocation9 + $0x108] sm:$0xff]  ;;  %v500_v29 = vld [vmem:[#allocation9 + $0x100] sm:$0xff]  ;;  %v499_v31 = vld [vmem:[#allocation9 + $0xf8] sm:$0xff] }
  0x24   :  { %321 = vmatpush.msra.mxu3 %v308_v11  ;;  %v927_v30 = vld [vmem:[%s1016_s2 + $0x8] sm:$0xff]  ;;  %v498_v32 = vld [vmem:[#allocation9 + $0xf0] sm:$0xff]  ;;  %v496_v34 = vld [vmem:[#allocation9 + $0xe0] sm:$0xff]  ;;  %s855_s2 = smov 127  }
  0x25   :  { %137 = vmatpush.msra.mxu0 %v115_v8  ;;  %v497_v33 = vld [vmem:[#allocation9 + $0xe8] sm:$0xff]  ;;  %v495_v35 = vld [vmem:[#allocation9 + $0xd8] sm:$0xff]  ;;  %v494_v36 = vld [vmem:[#allocation9 + $0xd0] sm:$0xff] }
  0x26   :  { %322 = vmatpush.msra.mxu3 %v307_v13  ;;  %v493_v37 = vld [vmem:[#allocation9 + $0xc8] sm:$0xff]  ;;  %v492_v38 = vld [vmem:[#allocation9 + $0xc0] sm:$0xff]  ;;  %v107_v40 = vld [vmem:[#allocation7] sm:$0xff] }
  0x27   :  { %138 = vmatpush.msra.mxu0 %v114_v10  ;;  %215 = vperm.xlu2 %717, %v107_v40   ;;  %v108_v41 = vld [vmem:[#allocation7 + $0x8] sm:$0xff]  ;;  %v489_v47 = vld [vmem:[#allocation7 + $0x20] sm:$0xff]  ;;  %v298_v48 = vld [vmem:[#allocation7 + $0x10] sm:$0xff] }
  0x28   :  { %323 = vmatpush.msra.mxu3 %v306_v15  ;;  %v490_v49 = vld [vmem:[#allocation7 + $0x28] sm:$0xff]  ;;  %v299_v52 = vld [vmem:[#allocation7 + $0x18] sm:$0xff]  ;;  %v261_v56 = vld [vmem:[#allocation10 + $0x50] sm:$0xff] }
  0x29   :  { %139 = vmatpush.msra.mxu0 %v113_v12  ;;  %v262_v55 = vld [vmem:[#allocation10 + $0x58] sm:$0xff]  ;;  %v260_v63 = vld [vmem:[#allocation10 + $0x48] sm:$0xff]  ;;  %v259_v0 = vld [vmem:[#allocation10 + $0x40] sm:$0xff] }
  0x2a   :  { %324 = vmatpush.msra.mxu3 %v305_v17  ;;  %273 = vmatpush.msra.mxu2 %v262_v55  ;;  %v258_v1 = vld [vmem:[#allocation10 + $0x38] sm:$0xff]  ;;  %v257_v2 = vld [vmem:[#allocation10 + $0x30] sm:$0xff]  ;;  %v256_v3 = vld [vmem:[#allocation10 + $0x28] sm:$0xff] }
  0x2b   :  { %140 = vmatpush.msra.mxu0 %v112_v14  ;;  %v255_v4 = vld [vmem:[#allocation10 + $0x20] sm:$0xff]  ;;  %v254_v5 = vld [vmem:[#allocation10 + $0x18] sm:$0xff]  ;;  %v253_v8 = vld [vmem:[#allocation10 + $0x10] sm:$0xff] }
  0x2c   :  { %325 = vmatpush.msra.mxu3 %v304_v19  ;;  %274 = vmatpush.msra.mxu2 %v261_v56  ;;  %v252_v10 = vld [vmem:[#allocation10 + $0x8] sm:$0xff]  ;;  %v251_v12 = vld [vmem:[#allocation10] sm:$0xff] }
  0x2d   :  { %141 = vmatpush.msra.mxu0 %v111_v16 }
  0x2e   :  { %326 = vmatpush.msra.mxu3 %v303_v21  ;;  %275 = vmatpush.msra.mxu2 %v260_v63  ;;  %v440_v63 = vld [vmem:[#allocation10 + $0x90] sm:$0xff] }
  0x2f   :  { %142 = vmatpush.msra.mxu0 %v110_v18  ;;  %220 = vperm.xlu2 %717, %v108_v41  }
  0x30   :  { %327 = vmatpush.msra.mxu3 %v302_v24  ;;  %276 = vmatpush.msra.mxu2 %v259_v0 }
  0x31   :  { %143 = vmatpush.msra.mxu0 %v109_v20 }
  0x32   :  { %687 = vmatmul.msk.f32.vlgmr.msra.gmra.mxu0 %vm121_vm0, %v916_v22  ;;  %328 = vmatpush.msra.mxu3 %v301_v26 }
  0x33   :  { %508 = vmatpush.msrb.mxu0 %v503_v23  ;;  %692 = vmatmul.msk.f32.vlgmr.msra.gmra.mxu3 %vm121_vm0, %v916_v22 }
  0x34   :  { %277 = vmatpush.msra.mxu2 %v258_v1  ;;  %v439_v1 = vld [vmem:[#allocation10 + $0x88] sm:$0xff] }
  0x35   :  { %509 = vmatpush.msrb.mxu0 %v502_v25 }
  0x36   :  { %278 = vmatpush.msra.mxu2 %v257_v2 }
  0x37   :  { %510 = vmatpush.msrb.mxu0 %v501_v27 }
  0x38   :  { %279 = vmatpush.msra.mxu2 %v256_v3  ;;  %v438_v3 = vld [vmem:[#allocation10 + $0x80] sm:$0xff] }
  0x39   :  { %511 = vmatpush.msrb.mxu0 %v500_v29 }
  0x3a   :  { %688 = vmatmul.msk.f32.gmra.mxu0 %vm121_vm0, %v927_v30  ;;  %280 = vmatpush.msra.mxu2 %v255_v4  ;;  %v437_v4 = vld [vmem:[#allocation10 + $0x78] sm:$0xff] }
  0x3b   :  { %512 = vmatpush.msrb.mxu0 %v499_v31  ;;  %693 = vmatmul.msk.f32.gmra.mxu3 %vm121_vm0, %v927_v30  ;;  %v203_v31 = vstv %s202_s26 }
  0x3c   :  { %281 = vmatpush.msra.mxu2 %v254_v5  ;;  %v246_v5 = vstv %s1014_s0 }
  0x3d   :  { %513 = vmatpush.msrb.mxu0 %v498_v32 }
  0x3e   :  { %282 = vmatpush.msra.mxu2 %v253_v8 }
  0x3f   :  { %514 = vmatpush.msrb.mxu0 %v497_v33 }
  0x40   :  { %283 = vmatpush.msra.mxu2 %v252_v10  ;;  %v977_v10 = vmul.f32 %v246_v5, %v916_v22 }
  0x41   :  { %515 = vmatpush.msrb.mxu0 %v496_v34 }
  0x42   :  { %284 = vmatpush.msra.mxu2 %v251_v12 }
  0x43   :  { %516 = vmatpush.msrb.mxu0 %v495_v35 }
  0x45   :  { %517 = vmatpush.msrb.mxu0 %v494_v36  ;;  %v208_v36 = vld [vmem:[#allocation6] sm:$0xff] }
  0x47   :  { %518 = vmatpush.msrb.mxu0 %v493_v37  ;;  %v209_v37 = vld [vmem:[#allocation6 + $0x8] sm:$0xff] }
  0x49   :  { %519 = vmatpush.msrb.mxu0 %v492_v38 }
  0x4a   :  { %698 = vmatmul.msk.f32.vlgmr.msrb.gmra.mxu0 %vm121_vm0, %v916_v22 }
  0x52   :  { %699 = vmatmul.msk.f32.gmra.mxu0 %vm121_vm0, %v927_v30 }
  0x81   :  { %v939_v54 = vpop.permute.xlu2 %215 }
  0x82   :  { %v223_v6 = vmul.f32 %v939_v54, %v916_v22 }
  0x89   :  { %v941_v58 = vpop.permute.xlu2 %220 }
  0x8a   :  { %v224_v7 = vmul.f32 %v941_v58, %v927_v30 }
  0x8c   :  { %v225_v11 = vpack.c.bf16 %v224_v7, %v223_v6  ;;  %v579_v7 = vstv %s700_s28 }
  0x8e   :  { %237 = vmatpush.bf16.msra.mxu1 %v225_v11  ;;  %v436_v11 = vld [vmem:[#allocation10 + $0x70] sm:$0xff] }
  0xaf   :  { %v145_v39 = vpop.f32.mrf.mxu0 }
  0xb0   :  { %192 = vperm.xlu1 %716, %v145_v39   ;;  %153 = vrot.lane.b32.xlu0 %v145_v39, %s855_s2 }
  0xb6   :  { %v330_v44 = vpop.f32.mrf.mxu3 }
  0xb7   :  { %v148_v42 = vpop.f32.mrf.mxu0 }
  0xb8   :  { %196 = vperm.xlu1 %716, %v148_v42   ;;  %155 = vrot.lane.b32.xlu0 %v148_v42, %s855_s2 }
  0xbe   :  { %v333_v46 = vpop.f32.mrf.mxu3 }
  0xc7   :  { %v521_v43 = vpop.f32.mrf.mxu0 }
  0xc8   :  { %529 = vrot.lane.b32.xlu1 %v521_v43, %s855_s2 }
  0xcf   :  { %v524_v45 = vpop.f32.mrf.mxu0 }
  0xd0   :  { %338 = vrot.lane.b32.xlu1 %v330_v44, %s855_s2  ;;  %531 = vrot.lane.b32.xlu2 %v524_v45, %s855_s2 }
  0xd8   :  { %340 = vrot.lane.b32.xlu2 %v333_v46, %s855_s2  ;;  %568 = vperm.xlu1 %716, %v521_v43  }
  0xe0   :  { %592 = vperm.xlu1 %716, %v489_v47   ;;  %572 = vperm.xlu2 %717, %v524_v45  }
  0xe8   :  { %377 = vperm.xlu1 %716, %v330_v44   ;;  %597 = vperm.xlu2 %717, %v490_v49   ;;  %v388_v44 = vstv %s694_s27  ;;  %v394_v49 = vld [vmem:[#allocation6 + $0x10] sm:$0xff] }
  0xf0   :  { %401 = vperm.xlu1 %716, %v298_v48   ;;  %381 = vperm.xlu2 %717, %v333_v46  }
  0xf8   :  { %406 = vperm.xlu2 %717, %v299_v52  }
 0x122   :  { %v154_v50 = vpop.permute.xlu0 %153  ;;  %v937_v51 = vpop.permute.xlu1 %192 }
 0x123   :  { %159 = vxpose.xlu0.b32.start [1/2] (short) (narrow) %v154_v50, 8  ;;  %v395_v50 = vld [vmem:[#allocation6 + $0x18] sm:$0xff] }
 0x12a   :  { %v156_v53 = vpop.permute.xlu0 %155  ;;  %v197_v57 = vpop.permute.xlu1 %196 }
 0x12b   :  { %160 = vxpose.xlu0.b32.end [2/2] (short) (narrow) %v156_v53, 8  ;;  %v532_v60 = vpop.permute.xlu2 %531 }
 0x133   :  { %v341_v62 = vpop.permute.xlu2 %340 }
 0x13a   :  { %v530_v59 = vpop.permute.xlu1 %529 }
 0x13b   :  { %535 = vxpose.xlu0.b32.start [1/2] (short) (narrow) %v530_v59, 8  ;;  %v949_v13 = vpop.permute.xlu2 %572  ;;  %v444_v59 = vld [vmem:[#allocation10 + $0xb0] sm:$0xff] }
 0x142   :  { %v339_v61 = vpop.permute.xlu1 %338 }
 0x143   :  { %344 = vxpose.xlu1.b32.start [1/2] (short) (narrow) %v339_v61, 8  ;;  %536 = vxpose.xlu0.b32.end [2/2] (short) (narrow) %v532_v60, 8  ;;  %v955_v16 = vpop.permute.xlu2 %597  ;;  %v443_v60 = vld [vmem:[#allocation10 + $0xa8] sm:$0xff]  ;;  %v442_v61 = vld [vmem:[#allocation10 + $0xa0] sm:$0xff] }
 0x144   :  { %v601_v17 = vmul.f32 %v955_v16, %v927_v30 }
 0x14a   :  { %v947_v9 = vpop.permute.xlu1 %568 }
 0x14b   :  { %345 = vxpose.xlu1.b32.end [2/2] (short) (narrow) %v341_v62, 8  ;;  %v382_v20 = vpop.permute.xlu2 %381  ;;  %v441_v62 = vld [vmem:[#allocation10 + $0x98] sm:$0xff] }
 0x152   :  { %v951_v14 = vpop.permute.xlu1 %592 }
 0x153   :  { %v600_v15 = vmul.f32 %v951_v14, %v916_v22  ;;  %v963_v24 = vpop.permute.xlu2 %406 }
 0x154   :  { %v410_v25 = vmul.f32 %v963_v24, %v927_v30 }
 0x155   :  { %v602_v19 = vpack.c.bf16 %v601_v17, %v600_v15 }
 0x157   :  { %613 = vmatpush.bf16.msrb.mxu2 %v602_v19 }
 0x15a   :  { %v378_v18 = vpop.permute.xlu1 %377 }
 0x162   :  { %v959_v21 = vpop.permute.xlu1 %401 }
 0x163   :  { %v409_v23 = vmul.f32 %v959_v21, %v916_v22  ;;  %v248_v22 = vmul.f32 %v246_v5, %v927_v30 }
 0x165   :  { %v411_v26 = vpack.c.bf16 %v410_v25, %v409_v23  ;;  %v434_v23 = vld [vmem:[#allocation10 + $0x60] sm:$0xff] }
 0x167   :  { %422 = vmatpush.bf16.msrb.mxu1 %v411_v26 }
 0x1aa   :  { %718 = vset.pattern.permute.xlu0 %v854_v28 }
 0x1c7   :  { %v175_v27 = vpop.trf.xlu0 }
 0x1c8   :  { %v199_v29 = vperm.slane %v175_v27, 0 }
 0x1ca   :  { %v200_v32 = vadd.f32 %v199_v29, %v937_v51  ;;  %v201_v33 = vadd.f32 %v199_v29, %v197_v57  ;;  %v445_v57 = vld [vmem:[#allocation10 + $0xb8] sm:$0xff]  ;;  %v586_v29 = vld [vmem:[#allocation6 + $0x28] sm:$0xff] }
 0x1cc   :  { %v204_v34 = vadd.f32 %v203_v31, %v200_v32  ;;  %v205_v35 = vadd.f32 %v203_v31, %v201_v33  ;;  %v636_v31 = vld [vmem:[#allocation10 + $0x118] sm:$0xff] }
 0x1cd   :  { %647 = vmatpush.msrb.mxu3 %v636_v31 }
 0x1ce   :  { %719 = vtanh.f32 %v204_v34 }
 0x1cf   :  { %721 = vtanh.f32 %v205_v35 }
 0x1d4   :  { %v720_v38 = vpop.eup %719 }
 0x1d5   :  { %v722_v39 = vpop.eup %721  ;;  %v210_v40 = vmul.f32 %v720_v38, %v208_v36 }
 0x1d6   :  { %v211_v41 = vmul.f32 %v722_v39, %v209_v37  ;;  %v635_v39 = vld [vmem:[#allocation10 + $0x110] sm:$0xff] }
 0x1d7   :  { %648 = vmatpush.msrb.mxu3 %v635_v39 }
 0x1d8   :  { %v212_v42 = vpack.c.bf16 %v211_v41, %v210_v40  ;;  %v634_v40 = vld [vmem:[#allocation10 + $0x108] sm:$0xff]  ;;  %v633_v41 = vld [vmem:[#allocation10 + $0x100] sm:$0xff] }
 0x1d9   :  { %649 = vmatpush.msrb.mxu3 %v634_v40 }
 0x1da   :  { %689 = vmatmul.msk.bf16.vlgmr.msra.gmra.mxu1 %vm226_vm1, %v212_v42  ;;  %v632_v42 = vld [vmem:[#allocation10 + $0xf8] sm:$0xff] }
 0x1db   :  { %456 = vmatpush.msra.mxu1 %v445_v57  ;;  %650 = vmatpush.msrb.mxu3 %v633_v41 }
 0x1dd   :  { %457 = vmatpush.msra.mxu1 %v444_v59  ;;  %651 = vmatpush.msrb.mxu3 %v632_v42 }
 0x1df   :  { %458 = vmatpush.msra.mxu1 %v443_v60  ;;  %v551_v0 = vpop.trf.xlu0 }
 0x1e0   :  { %v575_v2 = vperm.slane %v551_v0, 0 }
 0x1e1   :  { %459 = vmatpush.msra.mxu1 %v442_v61 }
 0x1e2   :  { %v576_v6 = vadd.f32 %v575_v2, %v947_v9  ;;  %v577_v8 = vadd.f32 %v575_v2, %v949_v13 }
 0x1e3   :  { %460 = vmatpush.msra.mxu1 %v441_v62 }
 0x1e4   :  { %v580_v15 = vadd.f32 %v579_v7, %v576_v6  ;;  %v581_v19 = vadd.f32 %v579_v7, %v577_v8 }
 0x1e5   :  { %461 = vmatpush.msra.mxu1 %v440_v63 }
 0x1e7   :  { %v360_v28 = vpop.trf.xlu1  ;;  %462 = vmatpush.msra.mxu1 %v439_v1 }
 0x1e8   :  { %v384_v43 = vperm.slane %v360_v28, 0  ;;  %v631_v28 = vld [vmem:[#allocation10 + $0xf0] sm:$0xff] }
 0x1e9   :  { %463 = vmatpush.msra.mxu1 %v438_v3  ;;  %652 = vmatpush.msrb.mxu3 %v631_v28 }
 0x1ea   :  { %v385_v45 = vadd.f32 %v384_v43, %v378_v18  ;;  %v386_v46 = vadd.f32 %v384_v43, %v382_v20  ;;  %v435_v18 = vld [vmem:[#allocation10 + $0x68] sm:$0xff]  ;;  %v629_v43 = vld [vmem:[#allocation10 + $0xe0] sm:$0xff] }
 0x1eb   :  { %464 = vmatpush.msra.mxu1 %v437_v4 }
 0x1ec   :  { %v389_v47 = vadd.f32 %v388_v44, %v385_v45  ;;  %v390_v48 = vadd.f32 %v388_v44, %v386_v46  ;;  %v628_v44 = vld [vmem:[#allocation10 + $0xd8] sm:$0xff]  ;;  %v626_v45 = vld [vmem:[#allocation10 + $0xc8] sm:$0xff]  ;;  %v625_v46 = vld [vmem:[#allocation10 + $0xc0] sm:$0xff] }
 0x1ed   :  { %465 = vmatpush.msra.mxu1 %v436_v11 }
 0x1ee   :  { %723 = vtanh.f32 %v389_v47 }
 0x1ef   :  { %725 = vtanh.f32 %v390_v48  ;;  %466 = vmatpush.msra.mxu1 %v435_v18 }
 0x1f0   :  { %727 = vtanh.f32 %v580_v15 }
 0x1f1   :  { %467 = vmatpush.msra.mxu1 %v434_v23  ;;  %729 = vtanh.f32 %v581_v19 }
 0x1f4   :  { %v724_v51 = vpop.eup %723 }
 0x1f5   :  { %v726_v52 = vpop.eup %725  ;;  %v396_v53 = vmul.f32 %v724_v51, %v394_v49 }
 0x1f6   :  { %v397_v55 = vmul.f32 %v726_v52, %v395_v50  ;;  %v728_v25 = vpop.eup %727 }
 0x1f7   :  { %v730_v27 = vpop.eup %729 }
 0x1f8   :  { %v398_v56 = vpack.c.bf16 %v397_v55, %v396_v53  ;;  %v588_v33 = vmul.f32 %v730_v27, %v586_v29 }
 0x1fa   :  { %695 = vmatmul.msk.bf16.vlgmr.msrb.gmra.mxu1 %vm226_vm1, %v398_v56 }
 0x257   :  { %v239_v12 = vpop.f32.mrf.mxu1 }
 0x258   :  { %v244_v17 = vmul.f32 %v239_v12, %v939_v54  ;;  %v585_v54 = vld [vmem:[#allocation6 + $0x20] sm:$0xff] }
 0x259   :  { %v587_v32 = vmul.f32 %v728_v25, %v585_v54 }
 0x25a   :  { %v249_v20 = vadd.f32 %v977_v10, %v244_v17 }
 0x25b   :  { %v589_v34 = vpack.c.bf16 %v588_v33, %v587_v32 }
 0x25c   :  { %690 = vmatmul.msk.f32.vlgmr.msra.gmra.mxu2 %vm121_vm0, %v249_v20 }
 0x25f   :  { %v241_v9 = vpop.f32.mrf.mxu1 }
 0x260   :  { %v245_v13 = vmul.f32 %v241_v9, %v941_v58 }
 0x262   :  { %v250_v26 = vadd.f32 %v248_v22, %v245_v13 }
 0x264   :  { %691 = vmatmul.msk.f32.gmra.mxu2 %vm121_vm0, %v250_v26 }
 0x26c   :  { %701 = vmatmul.msk.bf16.vlgmr.msrb.gmra.mxu2 %vm226_vm1, %v589_v34 }
 0x277   :  { %v424_v35 = vpop.f32.mrf.mxu1 }
 0x278   :  { %v429_v30 = vmul.f32 %v424_v35, %v959_v21  ;;  %v630_v21 = vld [vmem:[#allocation10 + $0xe8] sm:$0xff] }
 0x279   :  { %653 = vmatpush.msrb.mxu3 %v630_v21 }
 0x27a   :  { %v431_v36 = vadd.f32 %v429_v30, %v977_v10 }
 0x27b   :  { %654 = vmatpush.msrb.mxu3 %v629_v43 }
 0x27c   :  { %696 = vmatmul.msk.f32.vlgmr.msra.gmra.mxu1 %vm121_vm0, %v431_v36 }
 0x27d   :  { %655 = vmatpush.msrb.mxu3 %v628_v44 }
 0x27f   :  { %v426_v58 = vpop.f32.mrf.mxu1 }
 0x280   :  { %v430_v37 = vmul.f32 %v426_v58, %v963_v24  ;;  %v627_v24 = vld [vmem:[#allocation10 + $0xd0] sm:$0xff] }
 0x281   :  { %656 = vmatpush.msrb.mxu3 %v627_v24 }
 0x282   :  { %v432_v38 = vadd.f32 %v430_v37, %v248_v22 }
 0x283   :  { %657 = vmatpush.msrb.mxu3 %v626_v45 }
 0x284   :  { %697 = vmatmul.msk.f32.gmra.mxu1 %vm121_vm0, %v432_v38 }
 0x285   :  { %658 = vmatpush.msrb.mxu3 %v625_v46 }
 0x2df   :  { %v286_v47 = vpop.f32.mrf.mxu2 }
 0x2e0   :  { %v292_v48 = vmax.f32 %v286_v47, 0.0 }
 0x2e2   :  { %295 = vst.msk [vmem:[%s1021_s7] sm:$0xff] %vm294_vm2, %v292_v48 }
 0x2e7   :  { %v289_v49 = vpop.f32.mrf.mxu2 }
 0x2e8   :  { %v293_v50 = vmax.f32 %v289_v49, 0.0 }
 0x2ea   :  { %296 = vst.msk [vmem:[%s1021_s7 + $0x8] sm:$0xff] %vm294_vm2, %v293_v50 }
 0x2ef   :  { %v615_v51 = vpop.f32.mrf.mxu2 }
 0x2f0   :  { %v620_v52 = vmul.f32 %v615_v51, %v951_v14 }
 0x2f2   :  { %v622_v53 = vadd.f32 %v620_v52, %v977_v10 }
 0x2f4   :  { %702 = vmatmul.msk.f32.vlgmr.msrb.gmra.mxu3 %vm121_vm0, %v622_v53 }
 0x2f7   :  { %v617_v55 = vpop.f32.mrf.mxu2 }
 0x2f8   :  { %v621_v56 = vmul.f32 %v617_v55, %v955_v16 }
 0x2f9   :  { %v469_v57 = vpop.f32.mrf.mxu1 }
 0x2fa   :  { %v623_v59 = vadd.f32 %v621_v56, %v248_v22  ;;  %v475_v60 = vmax.f32 %v469_v57, 0.0 }
 0x2fc   :  { %479 = vrot.lane.b32.xlu2 %v475_v60, %s856_s11  ;;  %703 = vmatmul.msk.f32.gmra.mxu3 %vm121_vm0, %v623_v59 }
 0x301   :  { %v472_v61 = vpop.f32.mrf.mxu1 }
 0x302   :  { %v476_v62 = vmax.f32 %v472_v61, 0.0 }
 0x304   :  { %481 = vrot.lane.b32.xlu2 %v476_v62, %s856_s11 }
 0x356   :  { %v480_v63 = vpop.permute.xlu2 %479 }
 0x357   :  { %486 = vst.msk [vmem:[%s1021_s7] sm:$0xff] %vm485_vm3, %v480_v63 }
 0x35e   :  { %v482_v14 = vpop.permute.xlu2 %481 }
 0x35f   :  { %487 = vst.msk [vmem:[%s1021_s7 + $0x8] sm:$0xff] %vm485_vm3, %v482_v14 }
 0x377   :  { %v660_v16 = vpop.f32.mrf.mxu3 }
 0x378   :  { %v666_v0 = vmax.f32 %v660_v16, 0.0 }
 0x37a   :  { %670 = vrot.lane.b32.xlu0 %v666_v0, %s857_s15 }
 0x37f   :  { %v663_v1 = vpop.f32.mrf.mxu3 }
 0x380   :  { %v667_v2 = vmax.f32 %v663_v1, 0.0 }
 0x382   :  { %672 = vrot.lane.b32.xlu2 %v667_v2, %s857_s15 }
 0x3dc   :  { %v673_v3 = vpop.permute.xlu2 %672 }
 0x3dd   :  { %678 = vst.msk [vmem:[%s1021_s7 + $0x8] sm:$0xff] %vm676_vm4, %v673_v3 }
 0x3ec   :  { %v671_v4 = vpop.permute.xlu0 %670 }
 0x3ed   :  { %677 = vst.msk [vmem:[%s1021_s7] sm:$0xff] %vm676_vm4, %v671_v4 }
 0x3ee   :  { %683 = vsyncpa [#allocation4], 1 }
 0x3ef   :  { %684 = vsyncpa [#allocation8], 1 }
 0x3f0   :  { %685 = vsyncpa [#allocation11], 1 }
 0x3f1   :  { %686 = vsyncpa [#allocation5], 1 }

</bundles_post_ra>
